<compile_context>
chip_gen: v6e
topology: v6e:2x2x1
jax: 0.10.0
libtpu: 0.0.40
codegen_flags: <defaults>
</compile_context>

<pallas_src>
import functools

import jax
import jax.numpy as jnp
from jax.experimental import pallas as pl
from jax.experimental.pallas import tpu as pltpu


def _round_up(x, m):
    return (x + m - 1) // m * m


# ------------------------------- kernel --------------------------------------

def _basic_block_kernel(x_ref, w1_ref, b1_ref, w2_ref, b2_ref, *rest,
                        wp, lane_len, has_down):
    """Fused BasicBlock over a lane-batched slab of images.

    Activations are (C, L), L = B*Pb: B images, each a zero-padded (H+2, W+2)
    plane flattened onto the lane axis, rounded up to a multiple of 128 lanes.
    A 3x3 tap at offset (dh-1, dw-1) is a single flat lane rotation of the
    whole slab (pltpu.roll follows jnp.roll: out[i] = in[i - shift]); each
    image's zero pad ring absorbs the +-(Wp+1) offsets so taps never leak
    across images.

    NOTE: the `* mask` multiplies are LOAD-BEARING -- they re-zero the pad
    ring / lane tail so the flat-roll halo trick stays correct for the next
    conv / block.  Do not remove or reorder them.
    """
    if has_down:
        wd_ref, bd_ref, mask_ref, out_ref = rest
    else:
        mask_ref, out_ref = rest

    cout = out_ref.shape[1]
    x = x_ref[0]                                         # (Cin_p, L), compute dtype
    # Hoist the (1, L) -> (Cout_p, L) mask broadcast once (JAX doesn't CSE it).
    mask = jnp.broadcast_to(mask_ref[...], (cout, lane_len))

    def stacked_taps(src):
        # 9 shifted copies stacked on the sublane axis -> the whole 3x3 conv is
        # ONE MXU matmul with contraction depth 9*C (no VPU accumulation chain).
        pieces = []
        for dh in range(3):
            for dw in range(3):
                d = (dh - 1) * wp + (dw - 1)             # flat tap offset
                shift = (-d) % lane_len                  # jnp.roll convention
                pieces.append(src if shift == 0
                              else pltpu.roll(src, shift, axis=1))
        return jnp.concatenate(pieces, axis=0)           # (9*C, L)

    # conv1 (BN scale folded into weights, conv bias + BN shift in b1) + ReLU.
    h1 = jnp.dot(w1_ref[...], stacked_taps(x),
                 preferred_element_type=jnp.float32)
    h1 = jnp.maximum(h1 + b1_ref[...], 0.0)
    h1 = h1.astype(x.dtype) * mask                       # mask after downcast

    # conv2 + folded BN shift.
    y = jnp.dot(w2_ref[...], stacked_taps(h1),
                preferred_element_type=jnp.float32) + b2_ref[...]

    # identity path (optional folded 1x1 conv + BN).
    if has_down:
        idn = jnp.dot(wd_ref[...], x,
                      preferred_element_type=jnp.float32) + bd_ref[...]
    else:
        idn = x.astype(jnp.float32)

    out = jnp.maximum(y + idn, 0.0)
    out_ref[0] = out.astype(out_ref.dtype) * mask        # full lane-dense store


# --------------------------- host-side weight prep ---------------------------

def _fold_bn(cp, eps=1e-5):
    """Inference-mode BN fold: BN(conv(x)+b) = (scale*w)*x + shift."""
    scale = cp["gamma"] * jax.lax.rsqrt(cp["var"] + eps)
    shift = cp["beta"] + scale * (cp["b"] - cp["mean"])
    return scale, shift


def _prep_conv3x3(cp, cin_p, cout_p, dtype):
    scale, shift = _fold_bn(cp)
    w = cp["w"] * scale[:, None, None, None]             # fold BN scale into w
    cout, cin = w.shape[0], w.shape[1]
    w = jnp.pad(w, ((0, cout_p - cout), (0, cin_p - cin), (0, 0), (0, 0)))
    # (Cout_p, Cin_p, 3, 3) -> (Cout_p, 3, 3, Cin_p) -> (Cout_p, 9*Cin_p);
    # column block t = dh*3+dw matches the kernel's stacked-tap row order.
    w = jnp.transpose(w, (0, 2, 3, 1)).reshape(cout_p, 9 * cin_p)
    b = jnp.pad(shift, (0, cout_p - cout)).reshape(-1, 1)
    return w.astype(dtype), b.astype(jnp.float32)


def _prep_conv1x1(cp, cin_p, cout_p, dtype):
    scale, shift = _fold_bn(cp)
    w = cp["w"][:, :, 0, 0] * scale[:, None]
    cout, cin = w.shape
    w = jnp.pad(w, ((0, cout_p - cout), (0, cin_p - cin)))
    b = jnp.pad(shift, (0, cout_p - cout)).reshape(-1, 1)
    return w.astype(dtype), b.astype(jnp.float32)


# -------------------------- buffer layout helpers -----------------------------

def _to_buffer(x_nchw, n_pad, cin_p, b, pb, dtype):
    """NCHW -> (G, Cin_p, B*Pb): zero-padded (H+2,W+2) planes flattened onto the
    lane axis, B images concatenated along lanes per grid step."""
    n, c, h, w = x_nchw.shape
    xp = jnp.pad(x_nchw, ((0, n_pad - n), (0, cin_p - c), (1, 1), (1, 1)))
    flat = xp.reshape(n_pad, cin_p, (h + 2) * (w + 2))
    flat = jnp.pad(flat, ((0, 0), (0, 0), (0, pb - (h + 2) * (w + 2))))
    g = n_pad // b
    buf = flat.reshape(g, b, cin_p, pb).transpose(0, 2, 1, 3)
    return buf.reshape(g, cin_p, b * pb).astype(dtype)


def _from_buffer(buf, n, cout, h, w, b, pb):
    g, cp, _ = buf.shape
    hp, wp = h + 2, w + 2
    x = buf.reshape(g, cp, b, pb).transpose(0, 2, 1, 3).reshape(g * b, cp, pb)
    x = x[:n, :cout, :hp * wp].reshape(n, cout, hp, wp)
    return x[:, :, 1:h + 1, 1:w + 1]


# ------------------------------ block wrapper ---------------------------------

def basic_block_forward(xbuf, p, mask, wp, cout_p, compute_dtype):
    """One fused BasicBlock pallas_call over the lane-batched activation slab."""
    ngroups, cin_p, lane_len = xbuf.shape
    has_down = "down" in p

    w1, b1 = _prep_conv3x3(p["conv1"], cin_p, cout_p, compute_dtype)
    w2, b2 = _prep_conv3x3(p["conv2"], cout_p, cout_p, compute_dtype)

    kernel = functools.partial(_basic_block_kernel, wp=wp, lane_len=lane_len,
                               has_down=has_down)

    # Grid-invariant operands (constant index_map): single-buffer them so
    # duplicate weight copies don't eat VMEM at real ResNet widths (v7x: 64 MiB).
    const = dict(pipeline_mode=pl.Buffered(1))
    in_specs = [
        pl.BlockSpec((1, cin_p, lane_len), lambda n: (n, 0, 0)),      # x slab
        pl.BlockSpec((cout_p, 9 * cin_p), lambda n: (0, 0), **const),  # w1
        pl.BlockSpec((cout_p, 1), lambda n: (0, 0), **const),          # shift1
        pl.BlockSpec((cout_p, 9 * cout_p), lambda n: (0, 0), **const), # w2
        pl.BlockSpec((cout_p, 1), lambda n: (0, 0), **const),          # shift2
    ]
    args = [xbuf, w1, b1, w2, b2]
    if has_down:
        wd, bd = _prep_conv1x1(p["down"], cin_p, cout_p, compute_dtype)
        in_specs += [pl.BlockSpec((cout_p, cin_p), lambda n: (0, 0), **const),
                     pl.BlockSpec((cout_p, 1), lambda n: (0, 0), **const)]
        args += [wd, bd]
    in_specs.append(pl.BlockSpec((1, lane_len), lambda n: (0, 0), **const))
    args.append(mask)

    # TODO(synk): for large H*W / channel counts, tile padded rows with a 1-row
    # halo (and/or tile Cout) instead of holding the whole (C, B*Pb) slab; the
    # f32 temporaries are the first thing to blow v7x's 64 MiB VMEM.
    return pl.pallas_call(
        kernel,
        out_shape=jax.ShapeDtypeStruct((ngroups, cout_p, lane_len),
                                       compute_dtype),
        grid_spec=pltpu.PrefetchScalarGridSpec(
            num_scalar_prefetch=0,
            grid=(ngroups,),
            in_specs=in_specs,
            out_specs=pl.BlockSpec((1, cout_p, lane_len), lambda n: (n, 0, 0)),
        ),
        compiler_params=pltpu.CompilerParams(
            dimension_semantics=("parallel",),      # group axis -> both v7x TCs
            vmem_limit_bytes=32 * 1024 * 1024),
    )(*args)


def residual_layer_forward(x_nchw, params, compute_dtype=jnp.bfloat16,
                           batch_tile=None):
    n, cin, h, w = x_nchw.shape
    cout = params["first"]["conv1"]["w"].shape[0]
    # Pad channel counts to the sublane packing of the compute dtype so the
    # in-kernel 9-tap stack doesn't trigger layout shuffles.
    c_align = 16 if compute_dtype == jnp.bfloat16 else 8
    cin_p, cout_p = _round_up(cin, c_align), _round_up(cout, c_align)
    hp, wp = h + 2, w + 2
    pb = _round_up(hp * wp, 128)                    # per-image lane stripe

    # Lane-batch B images per grid step: amortizes per-step overhead and grows
    # the MXU N dim; sized against a conservative VMEM budget (v7x-safe).
    if batch_tile is None:
        cmax = max(cin_p, cout_p)
        per_image = ((cin_p + cout_p + 9 * cmax) * pb * 2   # ~bf16 operands
                     + 3 * cout_p * pb * 4)                  # f32 temporaries
        batch_tile = int(max(1, min(n, (8 << 20) // max(per_image, 1))))
    b = batch_tile
    ngroups = -(-n // b)
    lane_len = b * pb

    # Interior mask: 1 at real pixels, 0 on pad ring / lane tail (load-bearing
    # for the flat-roll halo trick -- every block re-zeroes the ring with it).
    u = jnp.arange(pb)
    ph, pw = u // wp, u % wp
    interior = (u < hp * wp) & (ph >= 1) & (ph <= h) & (pw >= 1) & (pw <= w)
    mask = jnp.tile(interior.astype(compute_dtype), (b,)).reshape(1, lane_len)

    buf = _to_buffer(x_nchw, ngroups * b, cin_p, b, pb, compute_dtype)
    buf = basic_block_forward(buf, params["first"], mask, wp, cout_p,
                              compute_dtype)
    for bp in params["blocks"]:
        buf = basic_block_forward(buf, bp, mask, wp, cout_p, compute_dtype)
    return _from_buffer(buf, n, cout, h, w, b, pb).astype(x_nchw.dtype)


# ----------------------------- parameters -------------------------------------

def _init_conv_bn(key, k, cin, cout):
    kw, kb, kg, kbe, km, kv = jax.random.split(key, 6)
    w = jax.random.normal(kw, (cout, cin, k, k), jnp.float32)
    w = w * (1.0 / (k * k * cin)) ** 0.5
    b = 0.1 * jax.random.normal(kb, (cout,), jnp.float32)
    gamma = 1.0 + 0.1 * jax.random.normal(kg, (cout,), jnp.float32)
    beta = 0.1 * jax.random.normal(kbe, (cout,), jnp.float32)
    mean = 0.1 * jax.random.normal(km, (cout,), jnp.float32)
    var = jnp.abs(jax.random.normal(kv, (cout,), jnp.float32)) + 1.0
    return {"w": w, "b": b, "gamma": gamma, "beta": beta,
            "mean": mean, "var": var}


def init_basic_block(key, cin, cout, downsample):
    k1, k2, kd = jax.random.split(key, 3)
    p = {"conv1": _init_conv_bn(k1, 3, cin, cout),
         "conv2": _init_conv_bn(k2, 3, cout, cout)}
    if downsample:
        p["down"] = _init_conv_bn(kd, 1, cin, cout)
    return p


def init_residual_layer(key, num_blocks, cin, cout):
    keys = jax.random.split(key, num_blocks + 1)
    return {"first": init_basic_block(keys[0], cin, cout, cin != cout),
            "blocks": [init_basic_block(k, cout, cout, False)
                       for k in keys[1:]]}


# --------------------------- pure-JAX reference --------------------------------

def _ref_conv_bn(x, cp, eps=1e-5):
    k = cp["w"].shape[-1]
    pad = (k - 1) // 2
    y = jax.lax.conv_general_dilated(
        x, cp["w"], window_strides=(1, 1),
        padding=((pad, pad), (pad, pad)),
        dimension_numbers=("NCHW", "OIHW", "NCHW"))
    y = y + cp["b"][None, :, None, None]
    inv = cp["gamma"] / jnp.sqrt(cp["var"] + eps)
    return ((y - cp["mean"][None, :, None, None]) * inv[None, :, None, None]
            + cp["beta"][None, :, None, None])


def _ref_block(x, p):
    identity = _ref_conv_bn(x, p["down"]) if "down" in p else x
    out = jax.nn.relu(_ref_conv_bn(x, p["conv1"]))
    out = _ref_conv_bn(out, p["conv2"])
    return jax.nn.relu(out + identity)


def residual_layer_reference(x, params):
    out = _ref_block(x, params["first"])
    for bp in params["blocks"]:
        out = _ref_block(out, bp)
    return out


# --------------------------------- main ----------------------------------------

if __name__ == "__main__":
    key = jax.random.PRNGKey(0)
    kx, kp = jax.random.split(key)

    N, Cin, Cout, H, W = 2, 4, 8, 16, 16
    num_blocks = 2

    x = jax.random.normal(kx, (N, Cin, H, W), jnp.float32)   # NCHW like PyTorch
    params = init_residual_layer(kp, num_blocks, Cin, Cout)

    ref = residual_layer_reference(x, params)
    ref_mag = float(jnp.max(jnp.abs(ref))) + 1e-6

    # Stricter structural check: f32 compute path vs the XLA conv reference.
    # A wrong tap / shift would produce O(ref_mag) error; this threshold only
    # tolerates matmul-precision-mode differences.
    out_f32 = jax.jit(functools.partial(residual_layer_forward,
                                        compute_dtype=jnp.float32))(x, params)
    out_f32 = jax.block_until_ready(out_f32)
    err_f32 = float(jnp.max(jnp.abs(out_f32 - ref)))
    assert err_f32 <= 0.03 * ref_mag + 0.02, (err_f32, ref_mag)

    # Production path: bf16 operands, f32 accumulation.
    out = jax.jit(residual_layer_forward)(x, params)
    out = jax.block_until_ready(out)

    assert out.shape == (N, Cout, H, W)
    assert bool(jnp.all(jnp.isfinite(out)))
    assert bool(jnp.all(out >= 0.0))          # final op is ReLU
    max_err = float(jnp.max(jnp.abs(out - ref)))
    # bf16 activations/weights with f32 accumulation over 3 blocks.
    assert max_err <= 0.08 * ref_mag + 0.05, (max_err, ref_mag)

    print("KERNEL_OK")
</pallas_src>

<mosaic_0001>
module attributes {stable_mosaic.version = 11 : i64} {
  func.func @_basic_block_kernel(%arg0: i32, %arg1: memref<1x8x768xf32, #tpu.memory_space<vmem>>, %arg2: memref<8x72xf32, #tpu.memory_space<vmem>>, %arg3: memref<8x1xf32, #tpu.memory_space<vmem>>, %arg4: memref<8x72xf32, #tpu.memory_space<vmem>>, %arg5: memref<8x1xf32, #tpu.memory_space<vmem>>, %arg6: memref<8x8xf32, #tpu.memory_space<vmem>>, %arg7: memref<8x1xf32, #tpu.memory_space<vmem>>, %arg8: memref<1x768xf32, #tpu.memory_space<vmem>>, %arg9: memref<1x8x768xf32, #tpu.memory_space<vmem>>) attributes {dimension_semantics = [#tpu.dimension_semantics<parallel>], iteration_bounds = array<i64: 1>, scalar_prefetch = 0 : i64, scratch_operands = 0 : i64, tpu.core_type = #tpu.core_type<tc>, window_params = [{transform_indices = @transform_0, window_bounds = array<i64: 1, 8, 768>}, {pipeline_mode = #tpu.pipeline_mode<synchronous>, transform_indices = @transform_1, window_bounds = array<i64: 8, 72>}, {pipeline_mode = #tpu.pipeline_mode<synchronous>, transform_indices = @transform_2, window_bounds = array<i64: 8, 1>}, {pipeline_mode = #tpu.pipeline_mode<synchronous>, transform_indices = @transform_3, window_bounds = array<i64: 8, 72>}, {pipeline_mode = #tpu.pipeline_mode<synchronous>, transform_indices = @transform_4, window_bounds = array<i64: 8, 1>}, {pipeline_mode = #tpu.pipeline_mode<synchronous>, transform_indices = @transform_5, window_bounds = array<i64: 8, 8>}, {pipeline_mode = #tpu.pipeline_mode<synchronous>, transform_indices = @transform_6, window_bounds = array<i64: 8, 1>}, {pipeline_mode = #tpu.pipeline_mode<synchronous>, transform_indices = @transform_7, window_bounds = array<i64: 1, 768>}, {transform_indices = @transform_8, window_bounds = array<i64: 1, 8, 768>}]} {
    %c0 = arith.constant 0 : index
    %c0_0 = arith.constant 0 : index
    %c0_1 = arith.constant 0 : index
    %0 = vector.load %arg1[%c0, %c0_0, %c0_1] : memref<1x8x768xf32, #tpu.memory_space<vmem>>, vector<1x8x768xf32>
    %1 = vector.shape_cast %0 : vector<1x8x768xf32> to vector<8x768xf32>
    %c0_2 = arith.constant 0 : index
    %c0_3 = arith.constant 0 : index
    %2 = vector.load %arg8[%c0_2, %c0_3] : memref<1x768xf32, #tpu.memory_space<vmem>>, vector<1x768xf32>
    %3 = vector.shape_cast %2 : vector<1x768xf32> to vector<1x768xf32>
    %4 = vector.broadcast %3 : vector<1x768xf32> to vector<8x768xf32>
    %c0_4 = arith.constant 0 : index
    %c0_5 = arith.constant 0 : index
    %5 = vector.load %arg2[%c0_4, %c0_5] : memref<8x72xf32, #tpu.memory_space<vmem>>, vector<8x72xf32>
    %c19_i32 = arith.constant 19 : i32
    %6 = tpu.dynamic_rotate %1 by %c19_i32 dim 1 : vector<8x768xf32>, i32 -> vector<8x768xf32>
    %c18_i32 = arith.constant 18 : i32
    %7 = tpu.dynamic_rotate %1 by %c18_i32 dim 1 : vector<8x768xf32>, i32 -> vector<8x768xf32>
    %c17_i32 = arith.constant 17 : i32
    %8 = tpu.dynamic_rotate %1 by %c17_i32 dim 1 : vector<8x768xf32>, i32 -> vector<8x768xf32>
    %c1_i32 = arith.constant 1 : i32
    %9 = tpu.dynamic_rotate %1 by %c1_i32 dim 1 : vector<8x768xf32>, i32 -> vector<8x768xf32>
    %c767_i32 = arith.constant 767 : i32
    %10 = tpu.dynamic_rotate %1 by %c767_i32 dim 1 : vector<8x768xf32>, i32 -> vector<8x768xf32>
    %c751_i32 = arith.constant 751 : i32
    %11 = tpu.dynamic_rotate %1 by %c751_i32 dim 1 : vector<8x768xf32>, i32 -> vector<8x768xf32>
    %c750_i32 = arith.constant 750 : i32
    %12 = tpu.dynamic_rotate %1 by %c750_i32 dim 1 : vector<8x768xf32>, i32 -> vector<8x768xf32>
    %c749_i32 = arith.constant 749 : i32
    %13 = tpu.dynamic_rotate %1 by %c749_i32 dim 1 : vector<8x768xf32>, i32 -> vector<8x768xf32>
    %14 = tpu.concatenate %6, %7, %8, %9, %1, %10, %11, %12, %13 in 0 : vector<8x768xf32>, vector<8x768xf32>, vector<8x768xf32>, vector<8x768xf32>, vector<8x768xf32>, vector<8x768xf32>, vector<8x768xf32>, vector<8x768xf32>, vector<8x768xf32> -> vector<72x768xf32>
    %cst = arith.constant dense<0.000000e+00> : vector<8x768xf32>
    %15 = tpu.matmul %5, %14, %cst {dimension_numbers = #tpu.dot_dimension_numbers<[1], [0], [0], [1], [0, 0, 1, 1], [], []>} : vector<8x72xf32>, vector<72x768xf32>, vector<8x768xf32> -> vector<8x768xf32>
    %c0_6 = arith.constant 0 : index
    %c0_7 = arith.constant 0 : index
    %16 = vector.load %arg3[%c0_6, %c0_7] : memref<8x1xf32, #tpu.memory_space<vmem>>, vector<8x1xf32>
    %17 = vector.broadcast %16 : vector<8x1xf32> to vector<8x768xf32>
    %18 = arith.addf %15, %17 : vector<8x768xf32>
    %cst_8 = arith.constant 0.000000e+00 : f32
    %19 = vector.broadcast %cst_8 : f32 to vector<8x768xf32>
    %20 = arith.maximumf %18, %19 : vector<8x768xf32>
    %21 = arith.mulf %20, %4 : vector<8x768xf32>
    %c0_9 = arith.constant 0 : index
    %c0_10 = arith.constant 0 : index
    %22 = vector.load %arg4[%c0_9, %c0_10] : memref<8x72xf32, #tpu.memory_space<vmem>>, vector<8x72xf32>
    %c19_i32_11 = arith.constant 19 : i32
    %23 = tpu.dynamic_rotate %21 by %c19_i32_11 dim 1 : vector<8x768xf32>, i32 -> vector<8x768xf32>
    %c18_i32_12 = arith.constant 18 : i32
    %24 = tpu.dynamic_rotate %21 by %c18_i32_12 dim 1 : vector<8x768xf32>, i32 -> vector<8x768xf32>
    %c17_i32_13 = arith.constant 17 : i32
    %25 = tpu.dynamic_rotate %21 by %c17_i32_13 dim 1 : vector<8x768xf32>, i32 -> vector<8x768xf32>
    %c1_i32_14 = arith.constant 1 : i32
    %26 = tpu.dynamic_rotate %21 by %c1_i32_14 dim 1 : vector<8x768xf32>, i32 -> vector<8x768xf32>
    %c767_i32_15 = arith.constant 767 : i32
    %27 = tpu.dynamic_rotate %21 by %c767_i32_15 dim 1 : vector<8x768xf32>, i32 -> vector<8x768xf32>
    %c751_i32_16 = arith.constant 751 : i32
    %28 = tpu.dynamic_rotate %21 by %c751_i32_16 dim 1 : vector<8x768xf32>, i32 -> vector<8x768xf32>
    %c750_i32_17 = arith.constant 750 : i32
    %29 = tpu.dynamic_rotate %21 by %c750_i32_17 dim 1 : vector<8x768xf32>, i32 -> vector<8x768xf32>
    %c749_i32_18 = arith.constant 749 : i32
    %30 = tpu.dynamic_rotate %21 by %c749_i32_18 dim 1 : vector<8x768xf32>, i32 -> vector<8x768xf32>
    %31 = tpu.concatenate %23, %24, %25, %26, %21, %27, %28, %29, %30 in 0 : vector<8x768xf32>, vector<8x768xf32>, vector<8x768xf32>, vector<8x768xf32>, vector<8x768xf32>, vector<8x768xf32>, vector<8x768xf32>, vector<8x768xf32>, vector<8x768xf32> -> vector<72x768xf32>
    %cst_19 = arith.constant dense<0.000000e+00> : vector<8x768xf32>
    %32 = tpu.matmul %22, %31, %cst_19 {dimension_numbers = #tpu.dot_dimension_numbers<[1], [0], [0], [1], [0, 0, 1, 1], [], []>} : vector<8x72xf32>, vector<72x768xf32>, vector<8x768xf32> -> vector<8x768xf32>
    %c0_20 = arith.constant 0 : index
    %c0_21 = arith.constant 0 : index
    %33 = vector.load %arg5[%c0_20, %c0_21] : memref<8x1xf32, #tpu.memory_space<vmem>>, vector<8x1xf32>
    %34 = vector.broadcast %33 : vector<8x1xf32> to vector<8x768xf32>
    %35 = arith.addf %32, %34 : vector<8x768xf32>
    %c0_22 = arith.constant 0 : index
    %c0_23 = arith.constant 0 : index
    %36 = vector.load %arg6[%c0_22, %c0_23] : memref<8x8xf32, #tpu.memory_space<vmem>>, vector<8x8xf32>
    %cst_24 = arith.constant dense<0.000000e+00> : vector<8x768xf32>
    %37 = tpu.matmul %36, %1, %cst_24 {dimension_numbers = #tpu.dot_dimension_numbers<[1], [0], [0], [1], [0, 0, 1, 1], [], []>} : vector<8x8xf32>, vector<8x768xf32>, vector<8x768xf32> -> vector<8x768xf32>
    %c0_25 = arith.constant 0 : index
    %c0_26 = arith.constant 0 : index
    %38 = vector.load %arg7[%c0_25, %c0_26] : memref<8x1xf32, #tpu.memory_space<vmem>>, vector<8x1xf32>
    %39 = vector.broadcast %38 : vector<8x1xf32> to vector<8x768xf32>
    %40 = arith.addf %37, %39 : vector<8x768xf32>
    %41 = arith.addf %35, %40 : vector<8x768xf32>
    %cst_27 = arith.constant 0.000000e+00 : f32
    %42 = vector.broadcast %cst_27 : f32 to vector<8x768xf32>
    %43 = arith.maximumf %41, %42 : vector<8x768xf32>
    %44 = arith.mulf %43, %4 : vector<8x768xf32>
    %c0_28 = arith.constant 0 : index
    %c0_29 = arith.constant 0 : index
    %c0_30 = arith.constant 0 : index
    %45 = vector.load %arg9[%c0_28, %c0_29, %c0_30] : memref<1x8x768xf32, #tpu.memory_space<vmem>>, vector<1x8x768xf32>
    %46 = vector.shape_cast %45 : vector<1x8x768xf32> to vector<8x768xf32>
    %47 = vector.shape_cast %44 : vector<8x768xf32> to vector<1x8x768xf32>
    tpu.vector_store %arg9[%c0_28, %c0_29, %c0_30], %47 {strides = array<i32>} : memref<1x8x768xf32, #tpu.memory_space<vmem>>, vector<1x8x768xf32>,
    return
  }
  func.func @transform_0(%arg0: i32) -> (i32, i32, i32) {
    %c0_i32 = arith.constant 0 : i32
    %c0_i32_0 = arith.constant 0 : i32
    %c0_i32_1 = arith.constant 0 : i32
    return %arg0, %c0_i32, %c0_i32_0 : i32, i32, i32
  }
  func.func @transform_1(%arg0: i32) -> (i32, i32) {
    %c0_i32 = arith.constant 0 : i32
    %c0_i32_0 = arith.constant 0 : i32
    %c0_i32_1 = arith.constant 0 : i32
    return %c0_i32, %c0_i32_0 : i32, i32
  }
  func.func @transform_2(%arg0: i32) -> (i32, i32) {
    %c0_i32 = arith.constant 0 : i32
    %c0_i32_0 = arith.constant 0 : i32
    %c0_i32_1 = arith.constant 0 : i32
    return %c0_i32, %c0_i32_0 : i32, i32
  }
  func.func @transform_3(%arg0: i32) -> (i32, i32) {
    %c0_i32 = arith.constant 0 : i32
    %c0_i32_0 = arith.constant 0 : i32
    %c0_i32_1 = arith.constant 0 : i32
    return %c0_i32, %c0_i32_0 : i32, i32
  }
  func.func @transform_4(%arg0: i32) -> (i32, i32) {
    %c0_i32 = arith.constant 0 : i32
    %c0_i32_0 = arith.constant 0 : i32
    %c0_i32_1 = arith.constant 0 : i32
    return %c0_i32, %c0_i32_0 : i32, i32
  }
  func.func @transform_5(%arg0: i32) -> (i32, i32) {
    %c0_i32 = arith.constant 0 : i32
    %c0_i32_0 = arith.constant 0 : i32
    %c0_i32_1 = arith.constant 0 : i32
    return %c0_i32, %c0_i32_0 : i32, i32
  }
  func.func @transform_6(%arg0: i32) -> (i32, i32) {
    %c0_i32 = arith.constant 0 : i32
    %c0_i32_0 = arith.constant 0 : i32
    %c0_i32_1 = arith.constant 0 : i32
    return %c0_i32, %c0_i32_0 : i32, i32
  }
  func.func @transform_7(%arg0: i32) -> (i32, i32) {
    %c0_i32 = arith.constant 0 : i32
    %c0_i32_0 = arith.constant 0 : i32
    %c0_i32_1 = arith.constant 0 : i32
    return %c0_i32, %c0_i32_0 : i32, i32
  }
  func.func @transform_8(%arg0: i32) -> (i32, i32, i32) {
    %c0_i32 = arith.constant 0 : i32
    %c0_i32_0 = arith.constant 0 : i32
    %c0_i32_1 = arith.constant 0 : i32
    return %arg0, %c0_i32, %c0_i32_0 : i32, i32, i32
  }
}

module attributes {stable_mosaic.version = 11 : i64} {
  func.func @_basic_block_kernel(%arg0: i32, %arg1: memref<1x8x768xf32, #tpu.memory_space<vmem>>, %arg2: memref<8x72xf32, #tpu.memory_space<vmem>>, %arg3: memref<8x1xf32, #tpu.memory_space<vmem>>, %arg4: memref<8x72xf32, #tpu.memory_space<vmem>>, %arg5: memref<8x1xf32, #tpu.memory_space<vmem>>, %arg6: memref<1x768xf32, #tpu.memory_space<vmem>>, %arg7: memref<1x8x768xf32, #tpu.memory_space<vmem>>) attributes {dimension_semantics = [#tpu.dimension_semantics<parallel>], iteration_bounds = array<i64: 1>, scalar_prefetch = 0 : i64, scratch_operands = 0 : i64, tpu.core_type = #tpu.core_type<tc>, window_params = [{transform_indices = @transform_0, window_bounds = array<i64: 1, 8, 768>}, {pipeline_mode = #tpu.pipeline_mode<synchronous>, transform_indices = @transform_1, window_bounds = array<i64: 8, 72>}, {pipeline_mode = #tpu.pipeline_mode<synchronous>, transform_indices = @transform_2, window_bounds = array<i64: 8, 1>}, {pipeline_mode = #tpu.pipeline_mode<synchronous>, transform_indices = @transform_3, window_bounds = array<i64: 8, 72>}, {pipeline_mode = #tpu.pipeline_mode<synchronous>, transform_indices = @transform_4, window_bounds = array<i64: 8, 1>}, {pipeline_mode = #tpu.pipeline_mode<synchronous>, transform_indices = @transform_5, window_bounds = array<i64: 1, 768>}, {transform_indices = @transform_6, window_bounds = array<i64: 1, 8, 768>}]} {
    %c0 = arith.constant 0 : index
    %c0_0 = arith.constant 0 : index
    %c0_1 = arith.constant 0 : index
    %0 = vector.load %arg1[%c0, %c0_0, %c0_1] : memref<1x8x768xf32, #tpu.memory_space<vmem>>, vector<1x8x768xf32>
    %1 = vector.shape_cast %0 : vector<1x8x768xf32> to vector<8x768xf32>
    %c0_2 = arith.constant 0 : index
    %c0_3 = arith.constant 0 : index
    %2 = vector.load %arg6[%c0_2, %c0_3] : memref<1x768xf32, #tpu.memory_space<vmem>>, vector<1x768xf32>
    %3 = vector.shape_cast %2 : vector<1x768xf32> to vector<1x768xf32>
    %4 = vector.broadcast %3 : vector<1x768xf32> to vector<8x768xf32>
    %c0_4 = arith.constant 0 : index
    %c0_5 = arith.constant 0 : index
    %5 = vector.load %arg2[%c0_4, %c0_5] : memref<8x72xf32, #tpu.memory_space<vmem>>, vector<8x72xf32>
    %c19_i32 = arith.constant 19 : i32
    %6 = tpu.dynamic_rotate %1 by %c19_i32 dim 1 : vector<8x768xf32>, i32 -> vector<8x768xf32>
    %c18_i32 = arith.constant 18 : i32
    %7 = tpu.dynamic_rotate %1 by %c18_i32 dim 1 : vector<8x768xf32>, i32 -> vector<8x768xf32>
    %c17_i32 = arith.constant 17 : i32
    %8 = tpu.dynamic_rotate %1 by %c17_i32 dim 1 : vector<8x768xf32>, i32 -> vector<8x768xf32>
    %c1_i32 = arith.constant 1 : i32
    %9 = tpu.dynamic_rotate %1 by %c1_i32 dim 1 : vector<8x768xf32>, i32 -> vector<8x768xf32>
    %c767_i32 = arith.constant 767 : i32
    %10 = tpu.dynamic_rotate %1 by %c767_i32 dim 1 : vector<8x768xf32>, i32 -> vector<8x768xf32>
    %c751_i32 = arith.constant 751 : i32
    %11 = tpu.dynamic_rotate %1 by %c751_i32 dim 1 : vector<8x768xf32>, i32 -> vector<8x768xf32>
    %c750_i32 = arith.constant 750 : i32
    %12 = tpu.dynamic_rotate %1 by %c750_i32 dim 1 : vector<8x768xf32>, i32 -> vector<8x768xf32>
    %c749_i32 = arith.constant 749 : i32
    %13 = tpu.dynamic_rotate %1 by %c749_i32 dim 1 : vector<8x768xf32>, i32 -> vector<8x768xf32>
    %14 = tpu.concatenate %6, %7, %8, %9, %1, %10, %11, %12, %13 in 0 : vector<8x768xf32>, vector<8x768xf32>, vector<8x768xf32>, vector<8x768xf32>, vector<8x768xf32>, vector<8x768xf32>, vector<8x768xf32>, vector<8x768xf32>, vector<8x768xf32> -> vector<72x768xf32>
    %cst = arith.constant dense<0.000000e+00> : vector<8x768xf32>
    %15 = tpu.matmul %5, %14, %cst {dimension_numbers = #tpu.dot_dimension_numbers<[1], [0], [0], [1], [0, 0, 1, 1], [], []>} : vector<8x72xf32>, vector<72x768xf32>, vector<8x768xf32> -> vector<8x768xf32>
    %c0_6 = arith.constant 0 : index
    %c0_7 = arith.constant 0 : index
    %16 = vector.load %arg3[%c0_6, %c0_7] : memref<8x1xf32, #tpu.memory_space<vmem>>, vector<8x1xf32>
    %17 = vector.broadcast %16 : vector<8x1xf32> to vector<8x768xf32>
    %18 = arith.addf %15, %17 : vector<8x768xf32>
    %cst_8 = arith.constant 0.000000e+00 : f32
    %19 = vector.broadcast %cst_8 : f32 to vector<8x768xf32>
    %20 = arith.maximumf %18, %19 : vector<8x768xf32>
    %21 = arith.mulf %20, %4 : vector<8x768xf32>
    %c0_9 = arith.constant 0 : index
    %c0_10 = arith.constant 0 : index
    %22 = vector.load %arg4[%c0_9, %c0_10] : memref<8x72xf32, #tpu.memory_space<vmem>>, vector<8x72xf32>
    %c19_i32_11 = arith.constant 19 : i32
    %23 = tpu.dynamic_rotate %21 by %c19_i32_11 dim 1 : vector<8x768xf32>, i32 -> vector<8x768xf32>
    %c18_i32_12 = arith.constant 18 : i32
    %24 = tpu.dynamic_rotate %21 by %c18_i32_12 dim 1 : vector<8x768xf32>, i32 -> vector<8x768xf32>
    %c17_i32_13 = arith.constant 17 : i32
    %25 = tpu.dynamic_rotate %21 by %c17_i32_13 dim 1 : vector<8x768xf32>, i32 -> vector<8x768xf32>
    %c1_i32_14 = arith.constant 1 : i32
    %26 = tpu.dynamic_rotate %21 by %c1_i32_14 dim 1 : vector<8x768xf32>, i32 -> vector<8x768xf32>
    %c767_i32_15 = arith.constant 767 : i32
    %27 = tpu.dynamic_rotate %21 by %c767_i32_15 dim 1 : vector<8x768xf32>, i32 -> vector<8x768xf32>
    %c751_i32_16 = arith.constant 751 : i32
    %28 = tpu.dynamic_rotate %21 by %c751_i32_16 dim 1 : vector<8x768xf32>, i32 -> vector<8x768xf32>
    %c750_i32_17 = arith.constant 750 : i32
    %29 = tpu.dynamic_rotate %21 by %c750_i32_17 dim 1 : vector<8x768xf32>, i32 -> vector<8x768xf32>
    %c749_i32_18 = arith.constant 749 : i32
    %30 = tpu.dynamic_rotate %21 by %c749_i32_18 dim 1 : vector<8x768xf32>, i32 -> vector<8x768xf32>
    %31 = tpu.concatenate %23, %24, %25, %26, %21, %27, %28, %29, %30 in 0 : vector<8x768xf32>, vector<8x768xf32>, vector<8x768xf32>, vector<8x768xf32>, vector<8x768xf32>, vector<8x768xf32>, vector<8x768xf32>, vector<8x768xf32>, vector<8x768xf32> -> vector<72x768xf32>
    %cst_19 = arith.constant dense<0.000000e+00> : vector<8x768xf32>
    %32 = tpu.matmul %22, %31, %cst_19 {dimension_numbers = #tpu.dot_dimension_numbers<[1], [0], [0], [1], [0, 0, 1, 1], [], []>} : vector<8x72xf32>, vector<72x768xf32>, vector<8x768xf32> -> vector<8x768xf32>
    %c0_20 = arith.constant 0 : index
    %c0_21 = arith.constant 0 : index
    %33 = vector.load %arg5[%c0_20, %c0_21] : memref<8x1xf32, #tpu.memory_space<vmem>>, vector<8x1xf32>
    %34 = vector.broadcast %33 : vector<8x1xf32> to vector<8x768xf32>
    %35 = arith.addf %32, %34 : vector<8x768xf32>
    %36 = arith.addf %35, %1 : vector<8x768xf32>
    %cst_22 = arith.constant 0.000000e+00 : f32
    %37 = vector.broadcast %cst_22 : f32 to vector<8x768xf32>
    %38 = arith.maximumf %36, %37 : vector<8x768xf32>
    %39 = arith.mulf %38, %4 : vector<8x768xf32>
    %c0_23 = arith.constant 0 : index
    %c0_24 = arith.constant 0 : index
    %c0_25 = arith.constant 0 : index
    %40 = vector.load %arg7[%c0_23, %c0_24, %c0_25] : memref<1x8x768xf32, #tpu.memory_space<vmem>>, vector<1x8x768xf32>
    %41 = vector.shape_cast %40 : vector<1x8x768xf32> to vector<8x768xf32>
    %42 = vector.shape_cast %39 : vector<8x768xf32> to vector<1x8x768xf32>
    tpu.vector_store %arg7[%c0_23, %c0_24, %c0_25], %42 {strides = array<i32>} : memref<1x8x768xf32, #tpu.memory_space<vmem>>, vector<1x8x768xf32>,
    return
  }
  func.func @transform_0(%arg0: i32) -> (i32, i32, i32) {
    %c0_i32 = arith.constant 0 : i32
    %c0_i32_0 = arith.constant 0 : i32
    %c0_i32_1 = arith.constant 0 : i32
    return %arg0, %c0_i32, %c0_i32_0 : i32, i32, i32
  }
  func.func @transform_1(%arg0: i32) -> (i32, i32) {
    %c0_i32 = arith.constant 0 : i32
    %c0_i32_0 = arith.constant 0 : i32
    %c0_i32_1 = arith.constant 0 : i32
    return %c0_i32, %c0_i32_0 : i32, i32
  }
  func.func @transform_2(%arg0: i32) -> (i32, i32) {
    %c0_i32 = arith.constant 0 : i32
    %c0_i32_0 = arith.constant 0 : i32
    %c0_i32_1 = arith.constant 0 : i32
    return %c0_i32, %c0_i32_0 : i32, i32
  }
  func.func @transform_3(%arg0: i32) -> (i32, i32) {
    %c0_i32 = arith.constant 0 : i32
    %c0_i32_0 = arith.constant 0 : i32
    %c0_i32_1 = arith.constant 0 : i32
    return %c0_i32, %c0_i32_0 : i32, i32
  }
  func.func @transform_4(%arg0: i32) -> (i32, i32) {
    %c0_i32 = arith.constant 0 : i32
    %c0_i32_0 = arith.constant 0 : i32
    %c0_i32_1 = arith.constant 0 : i32
    return %c0_i32, %c0_i32_0 : i32, i32
  }
  func.func @transform_5(%arg0: i32) -> (i32, i32) {
    %c0_i32 = arith.constant 0 : i32
    %c0_i32_0 = arith.constant 0 : i32
    %c0_i32_1 = arith.constant 0 : i32
    return %c0_i32, %c0_i32_0 : i32, i32
  }
  func.func @transform_6(%arg0: i32) -> (i32, i32, i32) {
    %c0_i32 = arith.constant 0 : i32
    %c0_i32_0 = arith.constant 0 : i32
    %c0_i32_1 = arith.constant 0 : i32
    return %arg0, %c0_i32, %c0_i32_0 : i32, i32, i32
  }
}

</mosaic_0001>

<bundles_post_ra>
// kernel: residual_layer_forward.4
= control target key start
LH: loop header
LB: loop body
LE: loop exit
PB: predicated region body
PF: predicated region fallthrough
CT: control target
= control target key end

     0   :  { %s863_s25 = smov 109   ;;  %s864_s28 = smov 110   ;;  %v870_v6 = vmov 0.0   ;;  %v872_v7 = vmov 0   ;;  %v31_v9 = vlaneseq  ;;  %vm222_vm8 = vcmask 588800   ;;  %s1574_s0 = inlined_call_operand.vmem [shape: f32[1,8,768], index: 0, kind: input, shape index: {}]   ;;  %s1575_s2 = inlined_call_operand.vmem [shape: f32[8,1], index: 2, kind: input, shape index: {}]   ;;  %s1576_s1 = inlined_call_operand.vmem [shape: f32[8,72], index: 1, kind: input, shape index: {}]   ;;  %s1577_s5 = inlined_call_operand.vmem [shape: f32[1,768], index: 5, kind: input, shape index: {}]   ;;  %s1578_s4 = inlined_call_operand.vmem [shape: f32[8,1], index: 4, kind: input, shape index: {}]   ;;  %s1579_s3 = inlined_call_operand.vmem [shape: f32[8,72], index: 3, kind: input, shape index: {}]   ;;  %s1580_s6 = inlined_call_operand.vmem [shape: f32[1,8,768], index: 6, kind: output, shape index: {}]  }
   0x1   :  { %v911_v0 = vld [vmem:[%s1574_s0 + $0x8] sm:$0xff]  ;;  %v916_v1 = vld [vmem:[%s1574_s0] sm:$0xff]  ;;  %v925_v2 = vld [vmem:[%s1574_s0 + $0x10] sm:$0xff]  ;;  %s865_s29 = smov 111   ;;  %s866_s30 = smov 127   ;;  %290 = vmatprep.mubr.f32.mxu0 %v870_v6  ;;  %361 = vmatprep.mubr.f32.mxu1 %v870_v6 }
   0x2   :  { %199 = vrot.lane.b32.xlu0 %v911_v0, %s863_s25  ;;  %197 = vrot.lane.b32.xlu1 %v916_v1, %s863_s25  ;;  %v950_v3 = vld [vmem:[%s1574_s0 + $0x18] sm:$0xff]  ;;  %v955_v4 = vld [vmem:[%s1574_s0 + $0x20] sm:$0xff]  ;;  %s867_s11 = smov 1   ;;  %s868_s14 = smov 17   ;;  %v1040_v10 = vand.u32 127, %v31_v9 }
   0x3   :  { %v968_v5 = vld [vmem:[%s1574_s0 + $0x28] sm:$0xff]  ;;  %s869_s0 = smov 18   ;;  %s871_s15 = smov 19   ;;  %862 = vset.pattern.permute.xlu0 %v872_v7  ;;  %v216_v8 = vld [vmem:[%s1575_s2] sm:$0xff] }
   0x4   :  { %vm209_vm0 = vcmp.lt.s32.totalorder %v1040_v10, 109  ;;  %vm190_vm1 = vcmp.lt.s32.totalorder %v1040_v10, 110  ;;  %vm171_vm2 = vcmp.lt.s32.totalorder %v1040_v10, 111  ;;  %vm152_vm3 = vcmp.lt.s32.totalorder %v1040_v10, 127 }
   0x5   :  { %vm133_vm4 = vcmp.lt.s32.totalorder %v1040_v10, 1  ;;  %vm114_vm5 = vcmp.lt.s32.totalorder %v1040_v10, 17  ;;  %vm95_vm6 = vcmp.lt.s32.totalorder %v1040_v10, 18  ;;  %vm76_vm7 = vcmp.lt.s32.totalorder %v1040_v10, 19 }
   0x6   :  { %201 = vrot.lane.b32.xlu0 %v925_v2, %s863_s25  ;;  %180 = vrot.lane.b32.xlu1 %v911_v0, %s864_s28 }
   0xa   :  { %182 = vrot.lane.b32.xlu0 %v925_v2, %s864_s28  ;;  %178 = vrot.lane.b32.xlu1 %v916_v1, %s864_s28 }
   0xe   :  { %161 = vrot.lane.b32.xlu0 %v911_v0, %s865_s29  ;;  %163 = vrot.lane.b32.xlu1 %v925_v2, %s865_s29 }
  0x12   :  { %159 = vrot.lane.b32.xlu0 %v916_v1, %s865_s29  ;;  %142 = vrot.lane.b32.xlu1 %v911_v0, %s866_s30 }
  0x16   :  { %144 = vrot.lane.b32.xlu0 %v925_v2, %s866_s30  ;;  %140 = vrot.lane.b32.xlu1 %v916_v1, %s866_s30 }
  0x1a   :  { %203 = vrot.lane.b32.xlu0 %v950_v3, %s863_s25  ;;  %205 = vrot.lane.b32.xlu1 %v955_v4, %s863_s25 }
  0x1e   :  { %121 = vrot.lane.b32.xlu0 %v916_v1, %s867_s11  ;;  %123 = vrot.lane.b32.xlu1 %v911_v0, %s867_s11 }
  0x22   :  { %131 = vrot.lane.b32.xlu0 %v968_v5, %s867_s11  ;;  %184 = vrot.lane.b32.xlu1 %v950_v3, %s864_s28 }
  0x26   :  { %186 = vrot.lane.b32.xlu0 %v955_v4, %s864_s28  ;;  %102 = vrot.lane.b32.xlu1 %v916_v1, %s868_s14 }
  0x2a   :  { %104 = vrot.lane.b32.xlu0 %v911_v0, %s868_s14  ;;  %112 = vrot.lane.b32.xlu1 %v968_v5, %s868_s14 }
  0x2e   :  { %165 = vrot.lane.b32.xlu0 %v950_v3, %s865_s29  ;;  %167 = vrot.lane.b32.xlu1 %v955_v4, %s865_s29 }
  0x32   :  { %83 = vrot.lane.b32.xlu0 %v916_v1, %s869_s0  ;;  %85 = vrot.lane.b32.xlu1 %v911_v0, %s869_s0 }
  0x36   :  { %93 = vrot.lane.b32.xlu0 %v968_v5, %s869_s0  ;;  %146 = vrot.lane.b32.xlu1 %v950_v3, %s866_s30 }
  0x3a   :  { %148 = vrot.lane.b32.xlu0 %v955_v4, %s866_s30  ;;  %62 = vrot.lane.b32.xlu1 %v916_v1, %s871_s15 }
  0x3e   :  { %64 = vrot.lane.b32.xlu0 %v911_v0, %s871_s15  ;;  %72 = vrot.lane.b32.xlu1 %v968_v5, %s871_s15 }
  0x42   :  { %207 = vrot.lane.b32.xlu0 %v968_v5, %s863_s25  ;;  %125 = vrot.lane.b32.xlu1 %v925_v2, %s867_s11 }
  0x46   :  { %127 = vrot.lane.b32.xlu0 %v950_v3, %s867_s11  ;;  %188 = vrot.lane.b32.xlu1 %v968_v5, %s864_s28 }
  0x4a   :  { %106 = vrot.lane.b32.xlu0 %v925_v2, %s868_s14  ;;  %108 = vrot.lane.b32.xlu1 %v950_v3, %s868_s14 }
  0x4e   :  { %169 = vrot.lane.b32.xlu0 %v968_v5, %s865_s29  ;;  %87 = vrot.lane.b32.xlu1 %v925_v2, %s869_s0 }
  0x52   :  { %89 = vrot.lane.b32.xlu0 %v950_v3, %s869_s0  ;;  %150 = vrot.lane.b32.xlu1 %v968_v5, %s866_s30 }
  0x56   :  { %66 = vrot.lane.b32.xlu0 %v925_v2, %s871_s15  ;;  %68 = vrot.lane.b32.xlu1 %v950_v3, %s871_s15 }
  0x5a   :  { %129 = vrot.lane.b32.xlu0 %v955_v4, %s867_s11  ;;  %110 = vrot.lane.b32.xlu1 %v955_v4, %s868_s14 }
  0x5e   :  { %91 = vrot.lane.b32.xlu0 %v955_v4, %s869_s0  ;;  %70 = vrot.lane.b32.xlu1 %v955_v4, %s871_s15 }
  0x62   :  { %219 = vperm.xlu0 %862, %v216_v8  }
  0x74   :  { %v200_v11 = vpop.permute.xlu0 %199  ;;  %v1042_v12 = vpop.permute.xlu1 %197 }
  0x75   :  { %v214_v16 = vsel %vm209_vm0, %v1042_v12, %v200_v11 }
  0x78   :  { %v202_v13 = vpop.permute.xlu0 %201  ;;  %v181_v14 = vpop.permute.xlu1 %180 }
  0x79   :  { %v213_v15 = vsel %vm209_vm0, %v200_v11, %v202_v13 }
  0x7a   :  { %240 = vmatprep.subr.mxu0 %v213_v15 }
  0x7b   :  { %241 = vmatpush1.msra.mxu0 %v214_v16 }
  0x7c   :  { %v183_v17 = vpop.permute.xlu0 %182  ;;  %v1051_v18 = vpop.permute.xlu1 %178 }
  0x7d   :  { %v194_v19 = vsel %vm190_vm1, %v181_v14, %v183_v17  ;;  %v195_v20 = vsel %vm190_vm1, %v1051_v18, %v181_v14 }
  0x7e   :  { %242 = vmatprep.subr.mxu0 %v194_v19 }
  0x7f   :  { %243 = vmatpush1.msra.mxu0 %v195_v20 }
  0x80   :  { %v162_v21 = vpop.permute.xlu0 %161  ;;  %v164_v22 = vpop.permute.xlu1 %163 }
  0x81   :  { %v175_v23 = vsel %vm171_vm2, %v162_v21, %v164_v22 }
  0x82   :  { %244 = vmatprep.subr.mxu0 %v175_v23 }
  0x84   :  { %v1061_v24 = vpop.permute.xlu0 %159  ;;  %v143_v25 = vpop.permute.xlu1 %142 }
  0x85   :  { %v176_v26 = vsel %vm171_vm2, %v1061_v24, %v162_v21 }
  0x86   :  { %245 = vmatpush1.msra.mxu0 %v176_v26 }
  0x88   :  { %v145_v27 = vpop.permute.xlu0 %144  ;;  %v1067_v28 = vpop.permute.xlu1 %140 }
  0x89   :  { %v156_v29 = vsel %vm152_vm3, %v143_v25, %v145_v27  ;;  %v157_v30 = vsel %vm152_vm3, %v1067_v28, %v143_v25 }
  0x8a   :  { %246 = vmatprep.subr.mxu0 %v156_v29 }
  0x8b   :  { %247 = vmatpush1.msra.mxu0 %v157_v30 }
  0x8c   :  { %v204_v31 = vpop.permute.xlu0 %203  ;;  %v1074_v32 = vpop.permute.xlu1 %205  ;;  %248 = vmatprep.subr.mxu0 %v911_v0 }
  0x8d   :  { %v211_v33 = vsel %vm209_vm0, %v204_v31, %v1074_v32  ;;  %v212_v34 = vsel %vm209_vm0, %v202_v13, %v204_v31  ;;  %249 = vmatpush1.msra.mxu0 %v916_v1  ;;  %v1137_v13 = vld [vmem:[%s1576_s1] sm:$0xff] }
  0x8e   :  { %311 = vmatprep.subr.mxu1 %v211_v33 }
  0x8f   :  { %312 = vmatpush1.msra.mxu1 %v212_v34 }
  0x90   :  { %v122_v35 = vpop.permute.xlu0 %121  ;;  %v1084_v36 = vpop.permute.xlu1 %123 }
  0x91   :  { %v138_v37 = vsel %vm133_vm4, %v122_v35, %v1084_v36 }
  0x92   :  { %250 = vmatprep.subr.mxu0 %v138_v37 }
  0x94   :  { %v1089_v38 = vpop.permute.xlu0 %131  ;;  %v185_v39 = vpop.permute.xlu1 %184 }
  0x95   :  { %v139_v40 = vsel %vm133_vm4, %v1089_v38, %v122_v35  ;;  %v193_v44 = vsel %vm190_vm1, %v183_v17, %v185_v39 }
  0x96   :  { %251 = vmatpush1.msra.mxu0 %v139_v40 }
  0x98   :  { %v187_v41 = vpop.permute.xlu0 %186  ;;  %v103_v42 = vpop.permute.xlu1 %102 }
  0x99   :  { %v192_v43 = vsel %vm190_vm1, %v185_v39, %v187_v41 }
  0x9a   :  { %313 = vmatprep.subr.mxu1 %v192_v43 }
  0x9b   :  { %314 = vmatpush1.msra.mxu1 %v193_v44 }
  0x9c   :  { %v105_v45 = vpop.permute.xlu0 %104  ;;  %v1099_v46 = vpop.permute.xlu1 %112 }
  0x9d   :  { %v119_v47 = vsel %vm114_vm5, %v103_v42, %v105_v45  ;;  %v120_v48 = vsel %vm114_vm5, %v1099_v46, %v103_v42 }
  0x9e   :  { %252 = vmatprep.subr.mxu0 %v119_v47 }
  0x9f   :  { %253 = vmatpush1.msra.mxu0 %v120_v48 }
  0xa0   :  { %v166_v49 = vpop.permute.xlu0 %165  ;;  %v168_v50 = vpop.permute.xlu1 %167 }
  0xa1   :  { %v173_v51 = vsel %vm171_vm2, %v166_v49, %v168_v50  ;;  %v174_v52 = vsel %vm171_vm2, %v164_v22, %v166_v49 }
  0xa2   :  { %315 = vmatprep.subr.mxu1 %v173_v51 }
  0xa3   :  { %316 = vmatpush1.msra.mxu1 %v174_v52 }
  0xa4   :  { %v84_v53 = vpop.permute.xlu0 %83  ;;  %v1111_v54 = vpop.permute.xlu1 %85 }
  0xa5   :  { %v100_v55 = vsel %vm95_vm6, %v84_v53, %v1111_v54 }
  0xa6   :  { %254 = vmatprep.subr.mxu0 %v100_v55 }
  0xa8   :  { %v1116_v56 = vpop.permute.xlu0 %93  ;;  %v147_v57 = vpop.permute.xlu1 %146 }
  0xa9   :  { %v101_v58 = vsel %vm95_vm6, %v1116_v56, %v84_v53  ;;  %v155_v62 = vsel %vm152_vm3, %v145_v27, %v147_v57  ;;  %v1211_v53 = vshrl.u32 %v31_v9, 7 }
  0xaa   :  { %255 = vmatpush1.msra.mxu0 %v101_v58 }
  0xab   :  { %v41_v9 = vsub.s32 2, %v1211_v53 }
  0xac   :  { %v149_v59 = vpop.permute.xlu0 %148  ;;  %v63_v60 = vpop.permute.xlu1 %62 }
  0xad   :  { %v154_v61 = vsel %vm152_vm3, %v147_v57, %v149_v59 }
  0xae   :  { %317 = vmatprep.subr.mxu1 %v154_v61 }
  0xaf   :  { %318 = vmatpush1.msra.mxu1 %v155_v62 }
  0xb0   :  { %v65_v63 = vpop.permute.xlu0 %64  ;;  %v1126_v7 = vpop.permute.xlu1 %72  ;;  %319 = vmatprep.subr.mxu1 %v950_v3 }
  0xb1   :  { %v81_v8 = vsel %vm76_vm7, %v63_v60, %v65_v63  ;;  %v82_v11 = vsel %vm76_vm7, %v1126_v7, %v63_v60  ;;  %320 = vmatpush1.msra.mxu1 %v925_v2 }
  0xb2   :  { %256 = vmatprep.subr.mxu0 %v81_v8 }
  0xb3   :  { %257 = vmatpush1.msra.mxu0 %v82_v11 }
  0xb4   :  { %v208_v14 = vpop.permute.xlu0 %207  ;;  %v126_v15 = vpop.permute.xlu1 %125  ;;  %846 = vmatmul.mubr.msk.f32.vlgmr.msra.gmra.mxu0 %vm222_vm8, %v1137_v13 }
  0xb5   :  { %v210_v16 = vsel %vm209_vm0, %v1074_v32, %v208_v14  ;;  %v215_v17 = vsel %vm209_vm0, %v208_v14, %v1042_v12  ;;  %432 = vmatprep.mubr.f32.mxu0 %v870_v6  ;;  %v137_v12 = vsel %vm133_vm4, %v1084_v36, %v126_v15  ;;  %v37_v14 = vsub.s32 1, %v1211_v53 }
  0xb6   :  { %382 = vmatprep.subr.mxu0 %v215_v17 }
  0xb7   :  { %383 = vmatpush1.msra.mxu0 %v210_v16 }
  0xb8   :  { %v128_v19 = vpop.permute.xlu0 %127  ;;  %v189_v20 = vpop.permute.xlu1 %188 }
  0xb9   :  { %v191_v21 = vsel %vm190_vm1, %v187_v41, %v189_v20  ;;  %v136_v22 = vsel %vm133_vm4, %v126_v15, %v128_v19  ;;  %v196_v23 = vsel %vm190_vm1, %v189_v20, %v1051_v18 }
  0xba   :  { %321 = vmatprep.subr.mxu1 %v136_v22  ;;  %384 = vmatprep.subr.mxu0 %v196_v23 }
  0xbb   :  { %322 = vmatpush1.msra.mxu1 %v137_v12  ;;  %385 = vmatpush1.msra.mxu0 %v191_v21  ;;  %v45_v21 = vsub.s32 3, %v1211_v53 }
  0xbc   :  { %v107_v25 = vpop.permute.xlu0 %106  ;;  %v109_v26 = vpop.permute.xlu1 %108 }
  0xbd   :  { %v117_v27 = vsel %vm114_vm5, %v107_v25, %v109_v26  ;;  %v118_v29 = vsel %vm114_vm5, %v105_v45, %v107_v25 }
  0xbe   :  { %323 = vmatprep.subr.mxu1 %v117_v27  ;;  %v49_v27 = vsub.s32 4, %v1211_v53 }
  0xbf   :  { %324 = vmatpush1.msra.mxu1 %v118_v29 }
  0xc0   :  { %v170_v30 = vpop.permute.xlu0 %169  ;;  %v88_v18 = vpop.permute.xlu1 %87 }
  0xc1   :  { %v172_v31 = vsel %vm171_vm2, %v168_v50, %v170_v30  ;;  %v177_v32 = vsel %vm171_vm2, %v170_v30, %v1061_v24  ;;  %v99_v24 = vsel %vm95_vm6, %v1111_v54, %v88_v18  ;;  %v33_v54 = vsub.s32 0, %v1211_v53 }
  0xc2   :  { %386 = vmatprep.subr.mxu0 %v177_v32 }
  0xc3   :  { %387 = vmatpush1.msra.mxu0 %v172_v31 }
  0xc4   :  { %v90_v33 = vpop.permute.xlu0 %89  ;;  %v151_v34 = vpop.permute.xlu1 %150 }
  0xc5   :  { %v153_v35 = vsel %vm152_vm3, %v149_v59, %v151_v34  ;;  %v98_v36 = vsel %vm95_vm6, %v88_v18, %v90_v33  ;;  %v158_v37 = vsel %vm152_vm3, %v151_v34, %v1067_v28 }
  0xc6   :  { %325 = vmatprep.subr.mxu1 %v98_v36  ;;  %388 = vmatprep.subr.mxu0 %v158_v37 }
  0xc7   :  { %326 = vmatpush1.msra.mxu1 %v99_v24  ;;  %389 = vmatpush1.msra.mxu0 %v153_v35  ;;  %v596_v24 = vld [vmem:[%s1578_s4] sm:$0xff] }
  0xc8   :  { %v67_v39 = vpop.permute.xlu0 %66  ;;  %v69_v40 = vpop.permute.xlu1 %68  ;;  %390 = vmatprep.subr.mxu0 %v968_v5 }
  0xc9   :  { %v79_v41 = vsel %vm76_vm7, %v67_v39, %v69_v40  ;;  %v80_v42 = vsel %vm76_vm7, %v65_v63, %v67_v39  ;;  %391 = vmatpush1.msra.mxu0 %v955_v4 }
  0xca   :  { %327 = vmatprep.subr.mxu1 %v79_v41 }
  0xcb   :  { %328 = vmatpush1.msra.mxu1 %v80_v42 }
  0xcc   :  { %v130_v28 = vpop.permute.xlu0 %129  ;;  %847 = vmatmul.mubr.msk.f32.vlgmr.msra.gmra.mxu1 %vm222_vm8, %v1137_v13  ;;  %v111_v43 = vpop.permute.xlu1 %110 }
  0xcd   :  { %v135_v44 = vsel %vm133_vm4, %v128_v19, %v130_v28  ;;  %v134_v45 = vsel %vm133_vm4, %v130_v28, %v1089_v38  ;;  %669 = vmatprep.mubr.f32.mxu1 %v870_v6  ;;  %v115_v47 = vsel %vm114_vm5, %v111_v43, %v1099_v46  ;;  %v116_v48 = vsel %vm114_vm5, %v109_v26, %v111_v43 }
  0xce   :  { %392 = vmatprep.subr.mxu0 %v134_v45 }
  0xcf   :  { %393 = vmatpush1.msra.mxu0 %v135_v44 }
  0xd0   :  { %v92_v49 = vpop.permute.xlu0 %91  ;;  %394 = vmatprep.subr.mxu0 %v115_v47  ;;  %v71_v50 = vpop.permute.xlu1 %70 }
  0xd1   :  { %v97_v51 = vsel %vm95_vm6, %v90_v33, %v92_v49  ;;  %395 = vmatpush1.msra.mxu0 %v116_v48  ;;  %v96_v38 = vsel %vm95_vm6, %v92_v49, %v1116_v56  ;;  %v77_v46 = vsel %vm76_vm7, %v71_v50, %v1126_v7  ;;  %v78_v52 = vsel %vm76_vm7, %v69_v40, %v71_v50  ;;  %v29_v56 = vld [vmem:[%s1577_s5] sm:$0x3f] }
  0xd2   :  { %396 = vmatprep.subr.mxu0 %v96_v38  ;;  %v1217_v58 = vrot.slane %v29_v56, %v33_v54  ;;  %v1225_v63 = vrot.slane %v29_v56, %v41_v9  ;;  %v1251_v16 = vrot.slane %v29_v56, %v37_v14  ;;  %v1269_v23 = vrot.slane %v29_v56, %v45_v21 }
  0xd3   :  { %397 = vmatpush1.msra.mxu0 %v97_v51  ;;  %v1287_v30 = vrot.slane %v29_v56, %v49_v27  ;;  %v53_v33 = vsub.s32 5, %v1211_v53 }
  0xd4   :  { %398 = vmatprep.subr.mxu0 %v77_v46 }
  0xd5   :  { %399 = vmatpush1.msra.mxu0 %v78_v52  ;;  %v1305_v35 = vrot.slane %v29_v56, %v53_v33 }
  0xd6   :  { %848 = vmatmul.mubr.msk.f32.vlgmr.msra.gmra.mxu0 %vm222_vm8, %v1137_v13 }
  0xd7   :  { %740 = vmatprep.mubr.f32.mxu0 %v870_v6 }
  0xdd   :  { %v220_v55 = vpop.permute.xlu0 %219 }
 0x174   :  { %v292_v57 = vpop.f32.mrf.mxu0 }
 0x175   :  { %v293_v59 = vadd.f32 %v292_v57, %v220_v55 }
 0x176   :  { %v294_v13 = vpop.f32.mrf.mxu0 }
 0x177   :  { %v439_v60 = vmax.f32 %v293_v59, 0.0  ;;  %v295_v15 = vadd.f32 %v294_v13, %v220_v55 }
 0x179   :  { %v1220_v61 = vmul.f32 %v439_v60, %v1217_v58  ;;  %v440_v17 = vmax.f32 %v295_v15, 0.0 }
 0x17b   :  { %578 = vrot.lane.b32.xlu0 %v1220_v61, %s863_s25  ;;  %v1258_v19 = vmul.f32 %v440_v17, %v1251_v16 }
 0x18c   :  { %v363_v62 = vpop.f32.mrf.mxu1 }
 0x18d   :  { %v364_v7 = vadd.f32 %v363_v62, %v220_v55 }
 0x18e   :  { %v365_v20 = vpop.f32.mrf.mxu1 }
 0x18f   :  { %v441_v8 = vmax.f32 %v364_v7, 0.0  ;;  %v366_v22 = vadd.f32 %v365_v20, %v220_v55 }
 0x191   :  { %v1228_v11 = vmul.f32 %v441_v8, %v1225_v63  ;;  %v442_v12 = vmax.f32 %v366_v22, 0.0 }
 0x193   :  { %564 = vrot.lane.b32.xlu0 %v1228_v11, %s864_s28  ;;  %582 = vrot.lane.b32.xlu1 %v1228_v11, %s863_s25  ;;  %v1276_v25 = vmul.f32 %v442_v12, %v1269_v23 }
 0x196   :  { %v434_v26 = vpop.f32.mrf.mxu0 }
 0x197   :  { %542 = vrot.lane.b32.xlu0 %v1220_v61, %s865_s29  ;;  %560 = vrot.lane.b32.xlu1 %v1220_v61, %s864_s28  ;;  %v435_v29 = vadd.f32 %v434_v26, %v220_v55 }
 0x198   :  { %v436_v32 = vpop.f32.mrf.mxu0 }
 0x199   :  { %v443_v18 = vmax.f32 %v435_v29, 0.0  ;;  %v437_v34 = vadd.f32 %v436_v32, %v220_v55 }
 0x19b   :  { %528 = vrot.lane.b32.xlu0 %v1228_v11, %s866_s30  ;;  %546 = vrot.lane.b32.xlu1 %v1228_v11, %s865_s29  ;;  %v1294_v31 = vmul.f32 %v443_v18, %v1287_v30  ;;  %v444_v36 = vmax.f32 %v437_v34, 0.0 }
 0x19d   :  { %v1312_v37 = vmul.f32 %v444_v36, %v1305_v35 }
 0x19f   :  { %506 = vrot.lane.b32.xlu0 %v1220_v61, %s867_s11  ;;  %524 = vrot.lane.b32.xlu1 %v1220_v61, %s866_s30 }
 0x1a3   :  { %470 = vrot.lane.b32.xlu0 %v1220_v61, %s869_s0  ;;  %488 = vrot.lane.b32.xlu1 %v1220_v61, %s868_s14 }
 0x1a7   :  { %510 = vrot.lane.b32.xlu0 %v1228_v11, %s867_s11  ;;  %452 = vrot.lane.b32.xlu1 %v1220_v61, %s871_s15 }
 0x1ab   :  { %544 = vrot.lane.b32.xlu0 %v1258_v19, %s865_s29  ;;  %492 = vrot.lane.b32.xlu1 %v1228_v11, %s868_s14 }
 0x1af   :  { %490 = vrot.lane.b32.xlu0 %v1258_v19, %s868_s14  ;;  %580 = vrot.lane.b32.xlu1 %v1258_v19, %s863_s25 }
 0x1b3   :  { %454 = vrot.lane.b32.xlu0 %v1258_v19, %s871_s15  ;;  %562 = vrot.lane.b32.xlu1 %v1258_v19, %s864_s28 }
 0x1b7   :  { %584 = vrot.lane.b32.xlu0 %v1276_v25, %s863_s25  ;;  %526 = vrot.lane.b32.xlu1 %v1258_v19, %s866_s30 }
 0x1bb   :  { %548 = vrot.lane.b32.xlu0 %v1276_v25, %s865_s29  ;;  %508 = vrot.lane.b32.xlu1 %v1258_v19, %s867_s11 }
 0x1bf   :  { %494 = vrot.lane.b32.xlu0 %v1276_v25, %s868_s14  ;;  %472 = vrot.lane.b32.xlu1 %v1258_v19, %s869_s0 }
 0x1c3   :  { %566 = vrot.lane.b32.xlu1 %v1276_v25, %s864_s28  ;;  %568 = vrot.lane.b32.xlu0 %v1294_v31, %s864_s28 }
 0x1c7   :  { %530 = vrot.lane.b32.xlu1 %v1276_v25, %s866_s30  ;;  %532 = vrot.lane.b32.xlu0 %v1294_v31, %s866_s30 }
 0x1cb   :  { %512 = vrot.lane.b32.xlu1 %v1276_v25, %s867_s11  ;;  %514 = vrot.lane.b32.xlu0 %v1294_v31, %s867_s11 }
 0x1cf   :  { %516 = vrot.lane.b32.xlu0 %v1312_v37, %s867_s11  ;;  %586 = vrot.lane.b32.xlu1 %v1294_v31, %s863_s25 }
 0x1d3   :  { %480 = vrot.lane.b32.xlu0 %v1312_v37, %s869_s0  ;;  %550 = vrot.lane.b32.xlu1 %v1294_v31, %s865_s29 }
 0x1d7   :  { %588 = vrot.lane.b32.xlu0 %v1312_v37, %s863_s25  ;;  %496 = vrot.lane.b32.xlu1 %v1294_v31, %s868_s14 }
 0x1db   :  { %552 = vrot.lane.b32.xlu0 %v1312_v37, %s865_s29  ;;  %498 = vrot.lane.b32.xlu1 %v1312_v37, %s868_s14 }
 0x1df   :  { %474 = vrot.lane.b32.xlu0 %v1228_v11, %s869_s0  ;;  %462 = vrot.lane.b32.xlu1 %v1312_v37, %s871_s15 }
 0x1e3   :  { %478 = vrot.lane.b32.xlu0 %v1294_v31, %s869_s0  ;;  %570 = vrot.lane.b32.xlu1 %v1312_v37, %s864_s28 }
 0x1e7   :  { %458 = vrot.lane.b32.xlu0 %v1276_v25, %s871_s15  ;;  %534 = vrot.lane.b32.xlu1 %v1312_v37, %s866_s30 }
 0x1eb   :  { %599 = vperm.xlu0 %862, %v596_v24   ;;  %476 = vrot.lane.b32.xlu1 %v1276_v25, %s869_s0 }
 0x1ed   :  { %v1351_v39 = vpop.permute.xlu0 %578 }
 0x1ef   :  { %456 = vrot.lane.b32.xlu1 %v1228_v11, %s871_s15 }
 0x1f3   :  { %460 = vrot.lane.b32.xlu1 %v1294_v31, %s871_s15 }
 0x205   :  { %v565_v40 = vpop.permute.xlu0 %564  ;;  %v583_v41 = vpop.permute.xlu1 %582 }
 0x209   :  { %v1353_v42 = vpop.permute.xlu0 %542  ;;  %v1355_v28 = vpop.permute.xlu1 %560 }
 0x20d   :  { %v1357_v43 = vpop.permute.xlu0 %528  ;;  %v1359_v44 = vpop.permute.xlu1 %546 }
 0x211   :  { %v507_v45 = vpop.permute.xlu0 %506  ;;  %v1361_v47 = vpop.permute.xlu1 %524 }
 0x215   :  { %v1363_v48 = vpop.permute.xlu0 %470  ;;  %v1365_v49 = vpop.permute.xlu1 %488 }
 0x219   :  { %v1367_v50 = vpop.permute.xlu0 %510  ;;  %v1369_v51 = vpop.permute.xlu1 %452 }
 0x21d   :  { %v545_v38 = vpop.permute.xlu0 %544  ;;  %v1371_v46 = vpop.permute.xlu1 %492 }
 0x21e   :  { %v557_v9 = vsel %vm171_vm2, %v545_v38, %v1359_v44  ;;  %v558_v62 = vsel %vm171_vm2, %v1353_v42, %v545_v38 }
 0x221   :  { %v1373_v52 = vpop.permute.xlu0 %490  ;;  %v581_v53 = vpop.permute.xlu1 %580 }
 0x222   :  { %v594_v54 = vsel %vm209_vm0, %v1351_v39, %v581_v53  ;;  %v593_v55 = vsel %vm209_vm0, %v581_v53, %v583_v41  ;;  %v504_v24 = vsel %vm114_vm5, %v1365_v49, %v1373_v52 }
 0x223   :  { %619 = vmatprep.subr.mxu1 %v593_v55 }
 0x224   :  { %620 = vmatpush1.msra.mxu1 %v594_v54 }
 0x225   :  { %v1380_v56 = vpop.permute.xlu0 %454  ;;  %v563_v57 = vpop.permute.xlu1 %562 }
 0x226   :  { %v576_v59 = vsel %vm190_vm1, %v1355_v28, %v563_v57  ;;  %v575_v60 = vsel %vm190_vm1, %v563_v57, %v565_v40 }
 0x227   :  { %621 = vmatprep.subr.mxu1 %v575_v60 }
 0x228   :  { %622 = vmatpush1.msra.mxu1 %v576_v59 }
 0x229   :  { %v585_v7 = vpop.permute.xlu0 %584  ;;  %623 = vmatprep.subr.mxu1 %v557_v9  ;;  %v527_v8 = vpop.permute.xlu1 %526 }
 0x22a   :  { %v540_v13 = vsel %vm152_vm3, %v1361_v47, %v527_v8  ;;  %624 = vmatpush1.msra.mxu1 %v558_v62  ;;  %v539_v14 = vsel %vm152_vm3, %v527_v8, %v1357_v43  ;;  %v592_v36 = vsel %vm209_vm0, %v583_v41, %v585_v7 }
 0x22b   :  { %625 = vmatprep.subr.mxu1 %v539_v14 }
 0x22c   :  { %626 = vmatpush1.msra.mxu1 %v540_v13 }
 0x22d   :  { %v549_v15 = vpop.permute.xlu0 %548  ;;  %627 = vmatprep.subr.mxu1 %v1258_v19  ;;  %v509_v17 = vpop.permute.xlu1 %508 }
 0x22e   :  { %628 = vmatpush1.msra.mxu1 %v1220_v61  ;;  %v522_v20 = vsel %vm133_vm4, %v507_v45, %v509_v17  ;;  %v556_v55 = vsel %vm171_vm2, %v1359_v44, %v549_v15  ;;  %v521_v9 = vsel %vm133_vm4, %v509_v17, %v1367_v50 }
 0x22f   :  { %629 = vmatprep.subr.mxu1 %v522_v20 }
 0x231   :  { %v1403_v21 = vpop.permute.xlu0 %494  ;;  %v1405_v22 = vpop.permute.xlu1 %472 }
 0x235   :  { %v1407_v12 = vpop.permute.xlu0 %568  ;;  %v567_v26 = vpop.permute.xlu1 %566 }
 0x236   :  { %v573_v38 = vsel %vm190_vm1, %v567_v26, %v1407_v12 }
 0x239   :  { %v1409_v27 = vpop.permute.xlu0 %532  ;;  %v531_v29 = vpop.permute.xlu1 %530 }
 0x23a   :  { %v537_v57 = vsel %vm152_vm3, %v531_v29, %v1409_v27 }
 0x23d   :  { %v1411_v18 = vpop.permute.xlu0 %514  ;;  %v1413_v19 = vpop.permute.xlu1 %512 }
 0x23e   :  { %v520_v44 = vsel %vm133_vm4, %v1367_v50, %v1413_v19  ;;  %v486_v50 = vsel %vm95_vm6, %v1363_v48, %v1405_v22 }
 0x241   :  { %v1415_v32 = vpop.permute.xlu0 %516  ;;  %v587_v61 = vpop.permute.xlu1 %586 }
 0x242   :  { %v523_v33 = vsel %vm133_vm4, %v1415_v32, %v507_v45  ;;  %v591_v34 = vsel %vm209_vm0, %v585_v7, %v587_v61  ;;  %v574_v45 = vsel %vm190_vm1, %v565_v40, %v567_v26  ;;  %v538_v40 = vsel %vm152_vm3, %v1357_v43, %v531_v29 }
 0x243   :  { %630 = vmatpush1.msra.mxu1 %v523_v33  ;;  %690 = vmatprep.subr.mxu0 %v591_v34 }
 0x244   :  { %631 = vmatprep.subr.mxu1 %v504_v24  ;;  %691 = vmatpush1.msra.mxu0 %v592_v36 }
 0x245   :  { %v1433_v53 = vpop.permute.xlu0 %480  ;;  %692 = vmatprep.subr.mxu0 %v573_v38  ;;  %v551_v41 = vpop.permute.xlu1 %550 }
 0x246   :  { %693 = vmatpush1.msra.mxu0 %v574_v45  ;;  %v555_v54 = vsel %vm171_vm2, %v549_v15, %v551_v41 }
 0x247   :  { %694 = vmatprep.subr.mxu0 %v555_v54 }
 0x248   :  { %695 = vmatpush1.msra.mxu0 %v556_v55 }
 0x249   :  { %v589_v59 = vpop.permute.xlu0 %588  ;;  %696 = vmatprep.subr.mxu0 %v537_v57  ;;  %v497_v60 = vpop.permute.xlu1 %496 }
 0x24a   :  { %697 = vmatpush1.msra.mxu0 %v538_v40  ;;  %v590_v14 = vsel %vm209_vm0, %v587_v61, %v589_v59 }
 0x24b   :  { %698 = vmatprep.subr.mxu0 %v1276_v25  ;;  %v503_v25 = vsel %vm114_vm5, %v1373_v52, %v1371_v46  ;;  %v451_v52 = vld [vmem:[%s1579_s3] sm:$0xff] }
 0x24c   :  { %699 = vmatpush1.msra.mxu0 %v1228_v11  ;;  %v502_v11 = vsel %vm114_vm5, %v1371_v46, %v1403_v21  ;;  %v468_v46 = vsel %vm76_vm7, %v1369_v51, %v1380_v56 }
 0x24d   :  { %700 = vmatprep.subr.mxu0 %v520_v44  ;;  %v499_v62 = vpop.permute.xlu1 %498  ;;  %v553_v7 = vpop.permute.xlu0 %552 }
 0x24e   :  { %v505_v43 = vsel %vm114_vm5, %v499_v62, %v1365_v49  ;;  %701 = vmatpush1.msra.mxu0 %v521_v9  ;;  %v487_v49 = vsel %vm95_vm6, %v1433_v53, %v1363_v48  ;;  %v595_v48 = vsel %vm209_vm0, %v589_v59, %v1351_v39  ;;  %v559_v39 = vsel %vm171_vm2, %v553_v7, %v1353_v42 }
 0x24f   :  { %632 = vmatpush1.msra.mxu1 %v505_v43  ;;  %702 = vmatprep.subr.mxu0 %v502_v11  ;;  %v554_v26 = vsel %vm171_vm2, %v551_v41, %v553_v7 }
 0x250   :  { %633 = vmatprep.subr.mxu1 %v486_v50  ;;  %703 = vmatpush1.msra.mxu0 %v503_v25 }
 0x251   :  { %634 = vmatpush1.msra.mxu1 %v487_v49  ;;  %v463_v8 = vpop.permute.xlu1 %462  ;;  %v475_v15 = vpop.permute.xlu0 %474 }
 0x252   :  { %v469_v13 = vsel %vm76_vm7, %v463_v8, %v1369_v51  ;;  %635 = vmatprep.subr.mxu1 %v468_v46 }
 0x253   :  { %636 = vmatpush1.msra.mxu1 %v469_v13 }
 0x254   :  { %849 = vmatmul.mubr.msk.f32.vlgmr.msra.gmra.mxu1 %vm222_vm8, %v451_v52  ;;  %761 = vmatprep.subr.mxu1 %v595_v48 }
 0x255   :  { %762 = vmatpush1.msra.mxu1 %v590_v14  ;;  %v571_v17 = vpop.permute.xlu1 %570  ;;  %811 = vmatprep.mubr.f32.mxu1 %v870_v6 }
 0x256   :  { %v572_v51 = vsel %vm190_vm1, %v1407_v12, %v571_v17  ;;  %v577_v20 = vsel %vm190_vm1, %v571_v17, %v1355_v28  ;;  %v479_v12 = vpop.permute.xlu0 %478 }
 0x257   :  { %763 = vmatprep.subr.mxu1 %v577_v20 }
 0x258   :  { %764 = vmatpush1.msra.mxu1 %v572_v51 }
 0x259   :  { %765 = vmatprep.subr.mxu1 %v559_v39  ;;  %v535_v29 = vpop.permute.xlu1 %534 }
 0x25a   :  { %v536_v6 = vsel %vm152_vm3, %v1409_v27, %v535_v29  ;;  %766 = vmatpush1.msra.mxu1 %v554_v26  ;;  %v541_v28 = vsel %vm152_vm3, %v535_v29, %v1361_v47  ;;  %v518_v27 = vsel %vm133_vm4, %v1411_v18, %v1415_v32  ;;  %v519_v47 = vsel %vm133_vm4, %v1413_v19, %v1411_v18  ;;  %v459_v33 = vpop.permute.xlu0 %458 }
 0x25b   :  { %767 = vmatprep.subr.mxu1 %v541_v28  ;;  %v501_v32 = vsel %vm114_vm5, %v1403_v21, %v497_v60  ;;  %v482_v19 = vsel %vm95_vm6, %v479_v12, %v1433_v53 }
 0x25c   :  { %768 = vmatpush1.msra.mxu1 %v536_v6 }
 0x25d   :  { %769 = vmatprep.subr.mxu1 %v1312_v37  ;;  %v477_v42 = vpop.permute.xlu1 %476  ;;  %v485_v37 = vsel %vm95_vm6, %v1405_v22, %v475_v15 }
 0x25e   :  { %770 = vmatpush1.msra.mxu1 %v1294_v31  ;;  %v484_v61 = vsel %vm95_vm6, %v475_v15, %v477_v42  ;;  %v500_v31 = vsel %vm114_vm5, %v497_v60, %v499_v62  ;;  %v483_v36 = vsel %vm95_vm6, %v477_v42, %v479_v12 }
 0x25f   :  { %704 = vmatprep.subr.mxu0 %v484_v61  ;;  %771 = vmatprep.subr.mxu1 %v518_v27 }
 0x260   :  { %705 = vmatpush1.msra.mxu0 %v485_v37  ;;  %772 = vmatpush1.msra.mxu1 %v519_v47 }
 0x261   :  { %773 = vmatprep.subr.mxu1 %v500_v31  ;;  %v457_v34 = vpop.permute.xlu1 %456 }
 0x262   :  { %v467_v18 = vsel %vm76_vm7, %v1380_v56, %v457_v34  ;;  %774 = vmatpush1.msra.mxu1 %v501_v32  ;;  %v466_v22 = vsel %vm76_vm7, %v457_v34, %v459_v33 }
 0x263   :  { %706 = vmatprep.subr.mxu0 %v466_v22  ;;  %775 = vmatprep.subr.mxu1 %v482_v19 }
 0x264   :  { %707 = vmatpush1.msra.mxu0 %v467_v18  ;;  %776 = vmatpush1.msra.mxu1 %v483_v36 }
 0x265   :  { %850 = vmatmul.mubr.msk.f32.vlgmr.msra.gmra.mxu0 %vm222_vm8, %v451_v52  ;;  %v461_v21 = vpop.permute.xlu1 %460 }
 0x266   :  { %v465_v56 = vsel %vm76_vm7, %v459_v33, %v461_v21  ;;  %v464_v24 = vsel %vm76_vm7, %v461_v21, %v463_v8  ;;  %v600_v38 = vpop.permute.xlu0 %599 }
 0x267   :  { %777 = vmatprep.subr.mxu1 %v464_v24 }
 0x268   :  { %778 = vmatpush1.msra.mxu1 %v465_v56 }
 0x269   :  { %851 = vmatmul.mubr.msk.f32.vlgmr.msra.gmra.mxu1 %vm222_vm8, %v451_v52 }
 0x314   :  { %v671_v45 = vpop.f32.mrf.mxu1 }
 0x315   :  { %v672_v53 = vadd.f32 %v671_v45, %v600_v38 }
 0x316   :  { %v673_v41 = vpop.f32.mrf.mxu1 }
 0x317   :  { %v818_v54 = vadd.f32 %v672_v53, %v916_v1  ;;  %v674_v55 = vadd.f32 %v673_v41, %v600_v38 }
 0x319   :  { %v824_v57 = vmax.f32 %v818_v54, 0.0  ;;  %v819_v40 = vadd.f32 %v674_v55, %v911_v0 }
 0x31b   :  { %v830_v59 = vmul.f32 %v824_v57, %v1217_v58  ;;  %v825_v60 = vmax.f32 %v819_v40, 0.0 }
 0x31d   :  { %836 = vst [vmem:[%s1580_s6] sm:$0xff] %v830_v59  ;;  %v831_v10 = vmul.f32 %v825_v60, %v1251_v16 }
 0x31f   :  { %837 = vst [vmem:[%s1580_s6 + $0x8] sm:$0xff] %v831_v10 }
 0x325   :  { %v742_v44 = vpop.f32.mrf.mxu0 }
 0x326   :  { %v743_v9 = vadd.f32 %v742_v44, %v600_v38 }
 0x327   :  { %v744_v1 = vpop.f32.mrf.mxu0 }
 0x328   :  { %v820_v62 = vadd.f32 %v743_v9, %v925_v2  ;;  %v745_v43 = vadd.f32 %v744_v1, %v600_v38 }
 0x329   :  { %v813_v0 = vpop.f32.mrf.mxu1 }
 0x32a   :  { %v826_v11 = vmax.f32 %v820_v62, 0.0  ;;  %v821_v58 = vadd.f32 %v745_v43, %v950_v3  ;;  %v814_v25 = vadd.f32 %v813_v0, %v600_v38 }
 0x32b   :  { %v815_v7 = vpop.f32.mrf.mxu1 }
 0x32c   :  { %v832_v50 = vmul.f32 %v826_v11, %v1225_v63  ;;  %v827_v49 = vmax.f32 %v821_v58, 0.0  ;;  %v822_v16 = vadd.f32 %v814_v25, %v955_v4  ;;  %v816_v8 = vadd.f32 %v815_v7, %v600_v38 }
 0x32e   :  { %838 = vst [vmem:[%s1580_s6 + $0x10] sm:$0xff] %v832_v50  ;;  %v833_v46 = vmul.f32 %v827_v49, %v1269_v23  ;;  %v828_v2 = vmax.f32 %v822_v16, 0.0  ;;  %v823_v52 = vadd.f32 %v816_v8, %v968_v5 }
 0x330   :  { %839 = vst [vmem:[%s1580_s6 + $0x18] sm:$0xff] %v833_v46  ;;  %v834_v3 = vmul.f32 %v828_v2, %v1287_v30  ;;  %v829_v63 = vmax.f32 %v823_v52, 0.0 }
 0x332   :  { %840 = vst [vmem:[%s1580_s6 + $0x20] sm:$0xff] %v834_v3  ;;  %v835_v4 = vmul.f32 %v829_v63, %v1305_v35 }
 0x334   :  { %841 = vst [vmem:[%s1580_s6 + $0x28] sm:$0xff] %v835_v4 }

// kernel: residual_layer_forward.3
= control target key start
LH: loop header
LB: loop body
LE: loop exit
PB: predicated region body
PF: predicated region fallthrough
CT: control target
= control target key end

     0   :  { %s1097_s9 = smov 109   ;;  %s1098_s12 = smov 110   ;;  %v1104_v6 = vmov 0.0   ;;  %v1106_v7 = vmov 0   ;;  %v37_v9 = vlaneseq  ;;  %vm228_vm8 = vcmask 588800   ;;  %s1847_s0 = inlined_call_operand.vmem [shape: f32[1,8,768], index: 0, kind: input, shape index: {}]   ;;  %s1848_s2 = inlined_call_operand.vmem [shape: f32[8,1], index: 2, kind: input, shape index: {}]   ;;  %s1849_s1 = inlined_call_operand.vmem [shape: f32[8,72], index: 1, kind: input, shape index: {}]   ;;  %s1850_s7 = inlined_call_operand.vmem [shape: f32[1,768], index: 7, kind: input, shape index: {}]   ;;  %s1851_s4 = inlined_call_operand.vmem [shape: f32[8,1], index: 4, kind: input, shape index: {}]   ;;  %s1852_s6 = inlined_call_operand.vmem [shape: f32[8,1], index: 6, kind: input, shape index: {}]   ;;  %s1853_s3 = inlined_call_operand.vmem [shape: f32[8,72], index: 3, kind: input, shape index: {}]   ;;  %s1854_s5 = inlined_call_operand.vmem [shape: f32[8,8], index: 5, kind: input, shape index: {}]   ;;  %s1855_s8 = inlined_call_operand.vmem [shape: f32[1,8,768], index: 8, kind: output, shape index: {}]  }
   0x1   :  { %v1155_v0 = vld [vmem:[%s1847_s0 + $0x8] sm:$0xff]  ;;  %v1160_v1 = vld [vmem:[%s1847_s0] sm:$0xff]  ;;  %v1169_v2 = vld [vmem:[%s1847_s0 + $0x10] sm:$0xff]  ;;  %s1099_s13 = smov 111   ;;  %s1100_s14 = smov 127   ;;  %296 = vmatprep.mubr.f32.mxu0 %v1104_v6  ;;  %367 = vmatprep.mubr.f32.mxu1 %v1104_v6  ;;  %vm831_vm9 = vcmask 64512  }
   0x2   :  { %205 = vrot.lane.b32.xlu0 %v1155_v0, %s1097_s9  ;;  %203 = vrot.lane.b32.xlu1 %v1160_v1, %s1097_s9  ;;  %v1194_v3 = vld [vmem:[%s1847_s0 + $0x18] sm:$0xff]  ;;  %v1199_v4 = vld [vmem:[%s1847_s0 + $0x20] sm:$0xff]  ;;  %s1101_s19 = smov 1   ;;  %s1102_s22 = smov 17   ;;  %v1284_v10 = vand.u32 127, %v37_v9 }
   0x3   :  { %v1212_v5 = vld [vmem:[%s1847_s0 + $0x28] sm:$0xff]  ;;  %s1103_s0 = smov 18   ;;  %s1105_s23 = smov 19   ;;  %1095 = vset.pattern.permute.xlu0 %v1106_v7  ;;  %1096 = vset.pattern.permute.xlu1 %v1106_v7  ;;  %v222_v8 = vld [vmem:[%s1848_s2] sm:$0xff] }
   0x4   :  { %vm215_vm0 = vcmp.lt.s32.totalorder %v1284_v10, 109  ;;  %vm196_vm1 = vcmp.lt.s32.totalorder %v1284_v10, 110  ;;  %vm177_vm2 = vcmp.lt.s32.totalorder %v1284_v10, 111  ;;  %vm158_vm3 = vcmp.lt.s32.totalorder %v1284_v10, 127 }
   0x5   :  { %vm139_vm4 = vcmp.lt.s32.totalorder %v1284_v10, 1  ;;  %vm120_vm5 = vcmp.lt.s32.totalorder %v1284_v10, 17  ;;  %vm101_vm6 = vcmp.lt.s32.totalorder %v1284_v10, 18  ;;  %vm82_vm7 = vcmp.lt.s32.totalorder %v1284_v10, 19 }
   0x6   :  { %207 = vrot.lane.b32.xlu0 %v1169_v2, %s1097_s9  ;;  %186 = vrot.lane.b32.xlu1 %v1155_v0, %s1098_s12 }
   0xa   :  { %188 = vrot.lane.b32.xlu0 %v1169_v2, %s1098_s12  ;;  %184 = vrot.lane.b32.xlu1 %v1160_v1, %s1098_s12 }
   0xe   :  { %167 = vrot.lane.b32.xlu0 %v1155_v0, %s1099_s13  ;;  %169 = vrot.lane.b32.xlu1 %v1169_v2, %s1099_s13 }
  0x12   :  { %165 = vrot.lane.b32.xlu0 %v1160_v1, %s1099_s13  ;;  %148 = vrot.lane.b32.xlu1 %v1155_v0, %s1100_s14 }
  0x16   :  { %150 = vrot.lane.b32.xlu0 %v1169_v2, %s1100_s14  ;;  %146 = vrot.lane.b32.xlu1 %v1160_v1, %s1100_s14 }
  0x1a   :  { %209 = vrot.lane.b32.xlu0 %v1194_v3, %s1097_s9  ;;  %211 = vrot.lane.b32.xlu1 %v1199_v4, %s1097_s9 }
  0x1e   :  { %127 = vrot.lane.b32.xlu0 %v1160_v1, %s1101_s19  ;;  %129 = vrot.lane.b32.xlu1 %v1155_v0, %s1101_s19 }
  0x22   :  { %137 = vrot.lane.b32.xlu0 %v1212_v5, %s1101_s19  ;;  %190 = vrot.lane.b32.xlu1 %v1194_v3, %s1098_s12 }
  0x26   :  { %192 = vrot.lane.b32.xlu0 %v1199_v4, %s1098_s12  ;;  %108 = vrot.lane.b32.xlu1 %v1160_v1, %s1102_s22 }
  0x2a   :  { %110 = vrot.lane.b32.xlu0 %v1155_v0, %s1102_s22  ;;  %118 = vrot.lane.b32.xlu1 %v1212_v5, %s1102_s22 }
  0x2e   :  { %171 = vrot.lane.b32.xlu0 %v1194_v3, %s1099_s13  ;;  %173 = vrot.lane.b32.xlu1 %v1199_v4, %s1099_s13 }
  0x32   :  { %89 = vrot.lane.b32.xlu0 %v1160_v1, %s1103_s0  ;;  %91 = vrot.lane.b32.xlu1 %v1155_v0, %s1103_s0 }
  0x36   :  { %99 = vrot.lane.b32.xlu0 %v1212_v5, %s1103_s0  ;;  %152 = vrot.lane.b32.xlu1 %v1194_v3, %s1100_s14 }
  0x3a   :  { %154 = vrot.lane.b32.xlu0 %v1199_v4, %s1100_s14  ;;  %68 = vrot.lane.b32.xlu1 %v1160_v1, %s1105_s23 }
  0x3e   :  { %70 = vrot.lane.b32.xlu0 %v1155_v0, %s1105_s23  ;;  %78 = vrot.lane.b32.xlu1 %v1212_v5, %s1105_s23 }
  0x42   :  { %213 = vrot.lane.b32.xlu0 %v1212_v5, %s1097_s9  ;;  %131 = vrot.lane.b32.xlu1 %v1169_v2, %s1101_s19 }
  0x46   :  { %133 = vrot.lane.b32.xlu0 %v1194_v3, %s1101_s19  ;;  %194 = vrot.lane.b32.xlu1 %v1212_v5, %s1098_s12 }
  0x4a   :  { %112 = vrot.lane.b32.xlu0 %v1169_v2, %s1102_s22  ;;  %114 = vrot.lane.b32.xlu1 %v1194_v3, %s1102_s22 }
  0x4e   :  { %175 = vrot.lane.b32.xlu0 %v1212_v5, %s1099_s13  ;;  %93 = vrot.lane.b32.xlu1 %v1169_v2, %s1103_s0 }
  0x52   :  { %95 = vrot.lane.b32.xlu0 %v1194_v3, %s1103_s0  ;;  %156 = vrot.lane.b32.xlu1 %v1212_v5, %s1100_s14 }
  0x56   :  { %72 = vrot.lane.b32.xlu0 %v1169_v2, %s1105_s23  ;;  %74 = vrot.lane.b32.xlu1 %v1194_v3, %s1105_s23 }
  0x5a   :  { %135 = vrot.lane.b32.xlu0 %v1199_v4, %s1101_s19  ;;  %116 = vrot.lane.b32.xlu1 %v1199_v4, %s1102_s22 }
  0x5e   :  { %97 = vrot.lane.b32.xlu0 %v1199_v4, %s1103_s0  ;;  %76 = vrot.lane.b32.xlu1 %v1199_v4, %s1105_s23 }
  0x62   :  { %225 = vperm.xlu0 %1095, %v222_v8  }
  0x74   :  { %v206_v11 = vpop.permute.xlu0 %205  ;;  %v1286_v12 = vpop.permute.xlu1 %203 }
  0x75   :  { %v220_v16 = vsel %vm215_vm0, %v1286_v12, %v206_v11 }
  0x78   :  { %v208_v13 = vpop.permute.xlu0 %207  ;;  %v187_v14 = vpop.permute.xlu1 %186 }
  0x79   :  { %v219_v15 = vsel %vm215_vm0, %v206_v11, %v208_v13 }
  0x7a   :  { %246 = vmatprep.subr.mxu0 %v219_v15 }
  0x7b   :  { %247 = vmatpush1.msra.mxu0 %v220_v16 }
  0x7c   :  { %v189_v17 = vpop.permute.xlu0 %188  ;;  %v1295_v18 = vpop.permute.xlu1 %184 }
  0x7d   :  { %v200_v19 = vsel %vm196_vm1, %v187_v14, %v189_v17  ;;  %v201_v20 = vsel %vm196_vm1, %v1295_v18, %v187_v14 }
  0x7e   :  { %248 = vmatprep.subr.mxu0 %v200_v19 }
  0x7f   :  { %249 = vmatpush1.msra.mxu0 %v201_v20 }
  0x80   :  { %v168_v21 = vpop.permute.xlu0 %167  ;;  %v170_v22 = vpop.permute.xlu1 %169 }
  0x81   :  { %v181_v23 = vsel %vm177_vm2, %v168_v21, %v170_v22 }
  0x82   :  { %250 = vmatprep.subr.mxu0 %v181_v23 }
  0x84   :  { %v1305_v24 = vpop.permute.xlu0 %165  ;;  %v149_v25 = vpop.permute.xlu1 %148 }
  0x85   :  { %v182_v26 = vsel %vm177_vm2, %v1305_v24, %v168_v21 }
  0x86   :  { %251 = vmatpush1.msra.mxu0 %v182_v26 }
  0x88   :  { %v151_v27 = vpop.permute.xlu0 %150  ;;  %v1311_v28 = vpop.permute.xlu1 %146 }
  0x89   :  { %v162_v29 = vsel %vm158_vm3, %v149_v25, %v151_v27  ;;  %v163_v30 = vsel %vm158_vm3, %v1311_v28, %v149_v25 }
  0x8a   :  { %252 = vmatprep.subr.mxu0 %v162_v29 }
  0x8b   :  { %253 = vmatpush1.msra.mxu0 %v163_v30 }
  0x8c   :  { %v210_v31 = vpop.permute.xlu0 %209  ;;  %v1318_v32 = vpop.permute.xlu1 %211  ;;  %254 = vmatprep.subr.mxu0 %v1155_v0 }
  0x8d   :  { %v217_v33 = vsel %vm215_vm0, %v210_v31, %v1318_v32  ;;  %v218_v34 = vsel %vm215_vm0, %v208_v13, %v210_v31  ;;  %255 = vmatpush1.msra.mxu0 %v1160_v1  ;;  %v1381_v13 = vld [vmem:[%s1849_s1] sm:$0xff] }
  0x8e   :  { %317 = vmatprep.subr.mxu1 %v217_v33 }
  0x8f   :  { %318 = vmatpush1.msra.mxu1 %v218_v34 }
  0x90   :  { %v128_v35 = vpop.permute.xlu0 %127  ;;  %v1328_v36 = vpop.permute.xlu1 %129 }
  0x91   :  { %v144_v37 = vsel %vm139_vm4, %v128_v35, %v1328_v36 }
  0x92   :  { %256 = vmatprep.subr.mxu0 %v144_v37 }
  0x94   :  { %v1333_v38 = vpop.permute.xlu0 %137  ;;  %v191_v39 = vpop.permute.xlu1 %190 }
  0x95   :  { %v145_v40 = vsel %vm139_vm4, %v1333_v38, %v128_v35  ;;  %v199_v44 = vsel %vm196_vm1, %v189_v17, %v191_v39 }
  0x96   :  { %257 = vmatpush1.msra.mxu0 %v145_v40 }
  0x98   :  { %v193_v41 = vpop.permute.xlu0 %192  ;;  %v109_v42 = vpop.permute.xlu1 %108 }
  0x99   :  { %v198_v43 = vsel %vm196_vm1, %v191_v39, %v193_v41 }
  0x9a   :  { %319 = vmatprep.subr.mxu1 %v198_v43 }
  0x9b   :  { %320 = vmatpush1.msra.mxu1 %v199_v44 }
  0x9c   :  { %v111_v45 = vpop.permute.xlu0 %110  ;;  %v1343_v46 = vpop.permute.xlu1 %118 }
  0x9d   :  { %v125_v47 = vsel %vm120_vm5, %v109_v42, %v111_v45  ;;  %v126_v48 = vsel %vm120_vm5, %v1343_v46, %v109_v42 }
  0x9e   :  { %258 = vmatprep.subr.mxu0 %v125_v47 }
  0x9f   :  { %259 = vmatpush1.msra.mxu0 %v126_v48 }
  0xa0   :  { %v172_v49 = vpop.permute.xlu0 %171  ;;  %v174_v50 = vpop.permute.xlu1 %173 }
  0xa1   :  { %v179_v51 = vsel %vm177_vm2, %v172_v49, %v174_v50  ;;  %v180_v52 = vsel %vm177_vm2, %v170_v22, %v172_v49 }
  0xa2   :  { %321 = vmatprep.subr.mxu1 %v179_v51 }
  0xa3   :  { %322 = vmatpush1.msra.mxu1 %v180_v52 }
  0xa4   :  { %v90_v53 = vpop.permute.xlu0 %89  ;;  %v1355_v54 = vpop.permute.xlu1 %91 }
  0xa5   :  { %v106_v55 = vsel %vm101_vm6, %v90_v53, %v1355_v54 }
  0xa6   :  { %260 = vmatprep.subr.mxu0 %v106_v55 }
  0xa8   :  { %v1360_v56 = vpop.permute.xlu0 %99  ;;  %v153_v57 = vpop.permute.xlu1 %152 }
  0xa9   :  { %v107_v58 = vsel %vm101_vm6, %v1360_v56, %v90_v53  ;;  %v161_v62 = vsel %vm158_vm3, %v151_v27, %v153_v57  ;;  %v1455_v53 = vshrl.u32 %v37_v9, 7 }
  0xaa   :  { %261 = vmatpush1.msra.mxu0 %v107_v58 }
  0xab   :  { %v47_v9 = vsub.s32 2, %v1455_v53 }
  0xac   :  { %v155_v59 = vpop.permute.xlu0 %154  ;;  %v69_v60 = vpop.permute.xlu1 %68 }
  0xad   :  { %v160_v61 = vsel %vm158_vm3, %v153_v57, %v155_v59 }
  0xae   :  { %323 = vmatprep.subr.mxu1 %v160_v61 }
  0xaf   :  { %324 = vmatpush1.msra.mxu1 %v161_v62 }
  0xb0   :  { %v71_v63 = vpop.permute.xlu0 %70  ;;  %v1370_v7 = vpop.permute.xlu1 %78  ;;  %325 = vmatprep.subr.mxu1 %v1194_v3 }
  0xb1   :  { %v87_v8 = vsel %vm82_vm7, %v69_v60, %v71_v63  ;;  %v88_v11 = vsel %vm82_vm7, %v1370_v7, %v69_v60  ;;  %326 = vmatpush1.msra.mxu1 %v1169_v2 }
  0xb2   :  { %262 = vmatprep.subr.mxu0 %v87_v8 }
  0xb3   :  { %263 = vmatpush1.msra.mxu0 %v88_v11 }
  0xb4   :  { %v214_v14 = vpop.permute.xlu0 %213  ;;  %v132_v15 = vpop.permute.xlu1 %131  ;;  %1076 = vmatmul.mubr.msk.f32.vlgmr.msra.gmra.mxu0 %vm228_vm8, %v1381_v13 }
  0xb5   :  { %v216_v16 = vsel %vm215_vm0, %v1318_v32, %v214_v14  ;;  %v221_v17 = vsel %vm215_vm0, %v214_v14, %v1286_v12  ;;  %438 = vmatprep.mubr.f32.mxu0 %v1104_v6  ;;  %v143_v12 = vsel %vm139_vm4, %v1328_v36, %v132_v15  ;;  %v43_v14 = vsub.s32 1, %v1455_v53 }
  0xb6   :  { %388 = vmatprep.subr.mxu0 %v221_v17 }
  0xb7   :  { %389 = vmatpush1.msra.mxu0 %v216_v16 }
  0xb8   :  { %v134_v19 = vpop.permute.xlu0 %133  ;;  %v195_v20 = vpop.permute.xlu1 %194 }
  0xb9   :  { %v197_v21 = vsel %vm196_vm1, %v193_v41, %v195_v20  ;;  %v142_v22 = vsel %vm139_vm4, %v132_v15, %v134_v19  ;;  %v202_v23 = vsel %vm196_vm1, %v195_v20, %v1295_v18 }
  0xba   :  { %327 = vmatprep.subr.mxu1 %v142_v22  ;;  %390 = vmatprep.subr.mxu0 %v202_v23 }
  0xbb   :  { %328 = vmatpush1.msra.mxu1 %v143_v12  ;;  %391 = vmatpush1.msra.mxu0 %v197_v21  ;;  %v51_v21 = vsub.s32 3, %v1455_v53 }
  0xbc   :  { %v113_v25 = vpop.permute.xlu0 %112  ;;  %v115_v26 = vpop.permute.xlu1 %114 }
  0xbd   :  { %v123_v27 = vsel %vm120_vm5, %v113_v25, %v115_v26  ;;  %v124_v29 = vsel %vm120_vm5, %v111_v45, %v113_v25 }
  0xbe   :  { %329 = vmatprep.subr.mxu1 %v123_v27  ;;  %v55_v27 = vsub.s32 4, %v1455_v53 }
  0xbf   :  { %330 = vmatpush1.msra.mxu1 %v124_v29 }
  0xc0   :  { %v176_v30 = vpop.permute.xlu0 %175  ;;  %v94_v18 = vpop.permute.xlu1 %93 }
  0xc1   :  { %v178_v31 = vsel %vm177_vm2, %v174_v50, %v176_v30  ;;  %v183_v32 = vsel %vm177_vm2, %v176_v30, %v1305_v24  ;;  %v105_v24 = vsel %vm101_vm6, %v1355_v54, %v94_v18  ;;  %v39_v54 = vsub.s32 0, %v1455_v53 }
  0xc2   :  { %392 = vmatprep.subr.mxu0 %v183_v32 }
  0xc3   :  { %393 = vmatpush1.msra.mxu0 %v178_v31 }
  0xc4   :  { %v96_v33 = vpop.permute.xlu0 %95  ;;  %v157_v34 = vpop.permute.xlu1 %156 }
  0xc5   :  { %v159_v35 = vsel %vm158_vm3, %v155_v59, %v157_v34  ;;  %v104_v36 = vsel %vm101_vm6, %v94_v18, %v96_v33  ;;  %v164_v37 = vsel %vm158_vm3, %v157_v34, %v1311_v28 }
  0xc6   :  { %331 = vmatprep.subr.mxu1 %v104_v36  ;;  %394 = vmatprep.subr.mxu0 %v164_v37 }
  0xc7   :  { %332 = vmatpush1.msra.mxu1 %v105_v24  ;;  %395 = vmatpush1.msra.mxu0 %v159_v35  ;;  %v602_v24 = vld [vmem:[%s1851_s4] sm:$0xff] }
  0xc8   :  { %v73_v39 = vpop.permute.xlu0 %72  ;;  %v75_v40 = vpop.permute.xlu1 %74  ;;  %396 = vmatprep.subr.mxu0 %v1212_v5 }
  0xc9   :  { %v85_v41 = vsel %vm82_vm7, %v73_v39, %v75_v40  ;;  %v86_v42 = vsel %vm82_vm7, %v71_v63, %v73_v39  ;;  %397 = vmatpush1.msra.mxu0 %v1199_v4  ;;  %v825_v39 = vld [vmem:[%s1852_s6] sm:$0xff] }
  0xca   :  { %333 = vmatprep.subr.mxu1 %v85_v41 }
  0xcb   :  { %334 = vmatpush1.msra.mxu1 %v86_v42 }
  0xcc   :  { %v136_v28 = vpop.permute.xlu0 %135  ;;  %1077 = vmatmul.mubr.msk.f32.vlgmr.msra.gmra.mxu1 %vm228_vm8, %v1381_v13  ;;  %v117_v43 = vpop.permute.xlu1 %116 }
  0xcd   :  { %v141_v44 = vsel %vm139_vm4, %v134_v19, %v136_v28  ;;  %v140_v45 = vsel %vm139_vm4, %v136_v28, %v1333_v38  ;;  %675 = vmatprep.mubr.f32.mxu1 %v1104_v6  ;;  %v121_v47 = vsel %vm120_vm5, %v117_v43, %v1343_v46  ;;  %v122_v48 = vsel %vm120_vm5, %v115_v26, %v117_v43 }
  0xce   :  { %398 = vmatprep.subr.mxu0 %v140_v45 }
  0xcf   :  { %399 = vmatpush1.msra.mxu0 %v141_v44 }
  0xd0   :  { %v98_v49 = vpop.permute.xlu0 %97  ;;  %400 = vmatprep.subr.mxu0 %v121_v47  ;;  %v77_v50 = vpop.permute.xlu1 %76 }
  0xd1   :  { %v103_v51 = vsel %vm101_vm6, %v96_v33, %v98_v49  ;;  %401 = vmatpush1.msra.mxu0 %v122_v48  ;;  %v102_v38 = vsel %vm101_vm6, %v98_v49, %v1360_v56  ;;  %v83_v46 = vsel %vm82_vm7, %v77_v50, %v1370_v7  ;;  %v84_v52 = vsel %vm82_vm7, %v75_v40, %v77_v50  ;;  %v35_v56 = vld [vmem:[%s1850_s7] sm:$0x3f] }
  0xd2   :  { %402 = vmatprep.subr.mxu0 %v102_v38  ;;  %v1461_v58 = vrot.slane %v35_v56, %v39_v54  ;;  %v1469_v63 = vrot.slane %v35_v56, %v47_v9  ;;  %v1499_v16 = vrot.slane %v35_v56, %v43_v14  ;;  %v1513_v23 = vrot.slane %v35_v56, %v51_v21 }
  0xd3   :  { %403 = vmatpush1.msra.mxu0 %v103_v51  ;;  %v1535_v30 = vrot.slane %v35_v56, %v55_v27  ;;  %v59_v33 = vsub.s32 5, %v1455_v53 }
  0xd4   :  { %404 = vmatprep.subr.mxu0 %v83_v46 }
  0xd5   :  { %405 = vmatpush1.msra.mxu0 %v84_v52  ;;  %v1549_v35 = vrot.slane %v35_v56, %v59_v33 }
  0xd6   :  { %1078 = vmatmul.mubr.msk.f32.vlgmr.msra.gmra.mxu0 %vm228_vm8, %v1381_v13 }
  0xd7   :  { %746 = vmatprep.mubr.f32.mxu0 %v1104_v6 }
  0xdd   :  { %v226_v55 = vpop.permute.xlu0 %225 }
 0x174   :  { %v298_v57 = vpop.f32.mrf.mxu0 }
 0x175   :  { %v299_v59 = vadd.f32 %v298_v57, %v226_v55 }
 0x176   :  { %v300_v13 = vpop.f32.mrf.mxu0 }
 0x177   :  { %v445_v60 = vmax.f32 %v299_v59, 0.0  ;;  %v301_v15 = vadd.f32 %v300_v13, %v226_v55 }
 0x179   :  { %v1464_v61 = vmul.f32 %v445_v60, %v1461_v58  ;;  %v446_v17 = vmax.f32 %v301_v15, 0.0 }
 0x17b   :  { %584 = vrot.lane.b32.xlu0 %v1464_v61, %s1097_s9  ;;  %v1506_v20 = vmul.f32 %v446_v17, %v1499_v16 }
 0x18c   :  { %v369_v62 = vpop.f32.mrf.mxu1 }
 0x18d   :  { %v370_v7 = vadd.f32 %v369_v62, %v226_v55 }
 0x18e   :  { %v371_v19 = vpop.f32.mrf.mxu1 }
 0x18f   :  { %v447_v8 = vmax.f32 %v370_v7, 0.0  ;;  %v372_v22 = vadd.f32 %v371_v19, %v226_v55 }
 0x191   :  { %v1472_v11 = vmul.f32 %v447_v8, %v1469_v63  ;;  %v448_v12 = vmax.f32 %v372_v22, 0.0 }
 0x193   :  { %570 = vrot.lane.b32.xlu0 %v1472_v11, %s1098_s12  ;;  %588 = vrot.lane.b32.xlu1 %v1472_v11, %s1097_s9  ;;  %v1520_v25 = vmul.f32 %v448_v12, %v1513_v23 }
 0x196   :  { %v440_v26 = vpop.f32.mrf.mxu0 }
 0x197   :  { %548 = vrot.lane.b32.xlu0 %v1464_v61, %s1099_s13  ;;  %566 = vrot.lane.b32.xlu1 %v1464_v61, %s1098_s12  ;;  %v441_v29 = vadd.f32 %v440_v26, %v226_v55 }
 0x198   :  { %v442_v31 = vpop.f32.mrf.mxu0 }
 0x199   :  { %v449_v18 = vmax.f32 %v441_v29, 0.0  ;;  %v443_v34 = vadd.f32 %v442_v31, %v226_v55 }
 0x19b   :  { %534 = vrot.lane.b32.xlu0 %v1472_v11, %s1100_s14  ;;  %552 = vrot.lane.b32.xlu1 %v1472_v11, %s1099_s13  ;;  %v1542_v32 = vmul.f32 %v449_v18, %v1535_v30  ;;  %v450_v36 = vmax.f32 %v443_v34, 0.0 }
 0x19d   :  { %v1556_v37 = vmul.f32 %v450_v36, %v1549_v35 }
 0x19f   :  { %512 = vrot.lane.b32.xlu0 %v1464_v61, %s1101_s19  ;;  %530 = vrot.lane.b32.xlu1 %v1464_v61, %s1100_s14 }
 0x1a3   :  { %476 = vrot.lane.b32.xlu0 %v1464_v61, %s1103_s0  ;;  %494 = vrot.lane.b32.xlu1 %v1464_v61, %s1102_s22 }
 0x1a7   :  { %498 = vrot.lane.b32.xlu0 %v1472_v11, %s1102_s22  ;;  %458 = vrot.lane.b32.xlu1 %v1464_v61, %s1105_s23 }
 0x1ab   :  { %480 = vrot.lane.b32.xlu0 %v1472_v11, %s1103_s0  ;;  %516 = vrot.lane.b32.xlu1 %v1472_v11, %s1101_s19 }
 0x1af   :  { %550 = vrot.lane.b32.xlu0 %v1506_v20, %s1099_s13  ;;  %586 = vrot.lane.b32.xlu1 %v1506_v20, %s1097_s9 }
 0x1b3   :  { %496 = vrot.lane.b32.xlu0 %v1506_v20, %s1102_s22  ;;  %568 = vrot.lane.b32.xlu1 %v1506_v20, %s1098_s12 }
 0x1b7   :  { %590 = vrot.lane.b32.xlu0 %v1520_v25, %s1097_s9  ;;  %532 = vrot.lane.b32.xlu1 %v1506_v20, %s1100_s14 }
 0x1bb   :  { %460 = vrot.lane.b32.xlu0 %v1506_v20, %s1105_s23  ;;  %514 = vrot.lane.b32.xlu1 %v1506_v20, %s1101_s19 }
 0x1bf   :  { %554 = vrot.lane.b32.xlu0 %v1520_v25, %s1099_s13  ;;  %478 = vrot.lane.b32.xlu1 %v1506_v20, %s1103_s0 }
 0x1c3   :  { %518 = vrot.lane.b32.xlu0 %v1520_v25, %s1101_s19  ;;  %572 = vrot.lane.b32.xlu1 %v1520_v25, %s1098_s12 }
 0x1c7   :  { %536 = vrot.lane.b32.xlu1 %v1520_v25, %s1100_s14  ;;  %574 = vrot.lane.b32.xlu0 %v1542_v32, %s1098_s12 }
 0x1cb   :  { %500 = vrot.lane.b32.xlu1 %v1520_v25, %s1102_s22  ;;  %538 = vrot.lane.b32.xlu0 %v1542_v32, %s1100_s14 }
 0x1cf   :  { %482 = vrot.lane.b32.xlu1 %v1520_v25, %s1103_s0  ;;  %522 = vrot.lane.b32.xlu0 %v1556_v37, %s1101_s19 }
 0x1d3   :  { %486 = vrot.lane.b32.xlu0 %v1556_v37, %s1103_s0  ;;  %592 = vrot.lane.b32.xlu1 %v1542_v32, %s1097_s9 }
 0x1d7   :  { %594 = vrot.lane.b32.xlu0 %v1556_v37, %s1097_s9  ;;  %556 = vrot.lane.b32.xlu1 %v1542_v32, %s1099_s13 }
 0x1db   :  { %558 = vrot.lane.b32.xlu0 %v1556_v37, %s1099_s13  ;;  %504 = vrot.lane.b32.xlu1 %v1556_v37, %s1102_s22 }
 0x1df   :  { %520 = vrot.lane.b32.xlu0 %v1542_v32, %s1101_s19  ;;  %468 = vrot.lane.b32.xlu1 %v1556_v37, %s1105_s23 }
 0x1e3   :  { %464 = vrot.lane.b32.xlu0 %v1520_v25, %s1105_s23  ;;  %576 = vrot.lane.b32.xlu1 %v1556_v37, %s1098_s12 }
 0x1e7   :  { %484 = vrot.lane.b32.xlu0 %v1542_v32, %s1103_s0  ;;  %540 = vrot.lane.b32.xlu1 %v1556_v37, %s1100_s14 }
 0x1eb   :  { %605 = vperm.xlu0 %1095, %v602_v24   ;;  %462 = vrot.lane.b32.xlu1 %v1472_v11, %s1105_s23 }
 0x1ed   :  { %v1598_v40 = vpop.permute.xlu0 %584 }
 0x1ef   :  { %502 = vrot.lane.b32.xlu1 %v1542_v32, %s1102_s22 }
 0x1f3   :  { %466 = vrot.lane.b32.xlu1 %v1542_v32, %s1105_s23 }
 0x1f7   :  { %828 = vperm.xlu1 %1096, %v825_v39  }
 0x205   :  { %v1600_v41 = vpop.permute.xlu0 %570  ;;  %v589_v42 = vpop.permute.xlu1 %588 }
 0x209   :  { %v1602_v28 = vpop.permute.xlu0 %548  ;;  %v1604_v43 = vpop.permute.xlu1 %566 }
 0x20d   :  { %v1606_v44 = vpop.permute.xlu0 %534  ;;  %v1608_v45 = vpop.permute.xlu1 %552 }
 0x211   :  { %v513_v47 = vpop.permute.xlu0 %512  ;;  %v1610_v48 = vpop.permute.xlu1 %530 }
 0x215   :  { %v1612_v49 = vpop.permute.xlu0 %476  ;;  %v1614_v50 = vpop.permute.xlu1 %494 }
 0x219   :  { %v1616_v51 = vpop.permute.xlu0 %498  ;;  %v1618_v38 = vpop.permute.xlu1 %458 }
 0x21d   :  { %v1620_v46 = vpop.permute.xlu0 %480  ;;  %v1622_v52 = vpop.permute.xlu1 %516 }
 0x221   :  { %v551_v53 = vpop.permute.xlu0 %550  ;;  %v587_v54 = vpop.permute.xlu1 %586 }
 0x222   :  { %v600_v55 = vsel %vm215_vm0, %v1598_v40, %v587_v54  ;;  %v599_v56 = vsel %vm215_vm0, %v587_v54, %v589_v42  ;;  %v563_v62 = vsel %vm177_vm2, %v551_v53, %v1608_v45  ;;  %v564_v7 = vsel %vm177_vm2, %v1602_v28, %v551_v53 }
 0x223   :  { %625 = vmatprep.subr.mxu1 %v599_v56 }
 0x224   :  { %626 = vmatpush1.msra.mxu1 %v600_v55 }
 0x225   :  { %v1629_v57 = vpop.permute.xlu0 %496  ;;  %v569_v59 = vpop.permute.xlu1 %568 }
 0x226   :  { %v582_v60 = vsel %vm196_vm1, %v1604_v43, %v569_v59  ;;  %v581_v9 = vsel %vm196_vm1, %v569_v59, %v1600_v41  ;;  %v510_v36 = vsel %vm120_vm5, %v1614_v50, %v1629_v57 }
 0x227   :  { %627 = vmatprep.subr.mxu1 %v581_v9 }
 0x228   :  { %628 = vmatpush1.msra.mxu1 %v582_v60 }
 0x229   :  { %v591_v8 = vpop.permute.xlu0 %590  ;;  %629 = vmatprep.subr.mxu1 %v563_v62  ;;  %v533_v13 = vpop.permute.xlu1 %532 }
 0x22a   :  { %v546_v14 = vsel %vm158_vm3, %v1610_v48, %v533_v13  ;;  %630 = vmatpush1.msra.mxu1 %v564_v7  ;;  %v545_v15 = vsel %vm158_vm3, %v533_v13, %v1606_v44  ;;  %v598_v54 = vsel %vm215_vm0, %v589_v42, %v591_v8 }
 0x22b   :  { %631 = vmatprep.subr.mxu1 %v545_v15  ;;  %v509_v15 = vsel %vm120_vm5, %v1629_v57, %v1616_v51 }
 0x22c   :  { %632 = vmatpush1.msra.mxu1 %v546_v14 }
 0x22d   :  { %v1649_v17 = vpop.permute.xlu0 %460  ;;  %633 = vmatprep.subr.mxu1 %v1506_v20  ;;  %v515_v19 = vpop.permute.xlu1 %514 }
 0x22e   :  { %634 = vmatpush1.msra.mxu1 %v1464_v61  ;;  %v528_v21 = vsel %vm139_vm4, %v513_v47, %v515_v19 }
 0x22f   :  { %635 = vmatprep.subr.mxu1 %v528_v21 }
 0x231   :  { %v555_v22 = vpop.permute.xlu0 %554  ;;  %v479_v12 = vpop.permute.xlu1 %478 }
 0x232   :  { %v562_v42 = vsel %vm177_vm2, %v1608_v45, %v555_v22  ;;  %v491_v21 = vsel %vm101_vm6, %v479_v12, %v1620_v46 }
 0x235   :  { %v1655_v26 = vpop.permute.xlu0 %518  ;;  %v573_v27 = vpop.permute.xlu1 %572 }
 0x236   :  { %v580_v55 = vsel %vm196_vm1, %v1600_v41, %v573_v27 }
 0x239   :  { %v1657_v29 = vpop.permute.xlu0 %574  ;;  %v537_v18 = vpop.permute.xlu1 %536 }
 0x23a   :  { %v544_v41 = vsel %vm158_vm3, %v1606_v44, %v537_v18 }
 0x23d   :  { %v1659_v31 = vpop.permute.xlu0 %538  ;;  %v1661_v33 = vpop.permute.xlu1 %500 }
 0x23e   :  { %v543_v9 = vsel %vm158_vm3, %v537_v18, %v1659_v31 }
 0x241   :  { %v1663_v20 = vpop.permute.xlu0 %522  ;;  %v1665_v34 = vpop.permute.xlu1 %482 }
 0x242   :  { %v529_v61 = vsel %vm139_vm4, %v1663_v20, %v513_v47  ;;  %v579_v47 = vsel %vm196_vm1, %v573_v27, %v1657_v29 }
 0x243   :  { %636 = vmatpush1.msra.mxu1 %v529_v61 }
 0x244   :  { %637 = vmatprep.subr.mxu1 %v510_v36 }
 0x245   :  { %v1674_v24 = vpop.permute.xlu0 %486  ;;  %v593_v39 = vpop.permute.xlu1 %592 }
 0x246   :  { %v597_v53 = vsel %vm215_vm0, %v591_v8, %v593_v39  ;;  %v492_v8 = vsel %vm101_vm6, %v1612_v49, %v479_v12  ;;  %v493_v44 = vsel %vm101_vm6, %v1674_v24, %v1612_v49  ;;  %v474_v49 = vsel %vm82_vm7, %v1618_v38, %v1649_v17 }
 0x247   :  { %696 = vmatprep.subr.mxu0 %v597_v53 }
 0x248   :  { %697 = vmatpush1.msra.mxu0 %v598_v54 }
 0x249   :  { %v595_v56 = vpop.permute.xlu0 %594  ;;  %698 = vmatprep.subr.mxu0 %v579_v47  ;;  %v557_v59 = vpop.permute.xlu1 %556 }
 0x24a   :  { %699 = vmatpush1.msra.mxu0 %v580_v55  ;;  %v561_v60 = vsel %vm177_vm2, %v555_v22, %v557_v59 }
 0x24b   :  { %700 = vmatprep.subr.mxu0 %v561_v60 }
 0x24c   :  { %701 = vmatpush1.msra.mxu0 %v562_v42 }
 0x24d   :  { %702 = vmatprep.subr.mxu0 %v543_v9  ;;  %v1697_v62 = vpop.permute.xlu1 %504  ;;  %v559_v45 = vpop.permute.xlu0 %558 }
 0x24e   :  { %v511_v7 = vsel %vm120_vm5, %v1697_v62, %v1614_v50  ;;  %703 = vmatpush1.msra.mxu0 %v544_v41  ;;  %v526_v50 = vsel %vm139_vm4, %v1622_v52, %v1655_v26  ;;  %v560_v12 = vsel %vm177_vm2, %v557_v59, %v559_v45 }
 0x24f   :  { %638 = vmatpush1.msra.mxu1 %v511_v7  ;;  %704 = vmatprep.subr.mxu0 %v1520_v25  ;;  %v527_v25 = vsel %vm139_vm4, %v515_v19, %v1622_v52  ;;  %v508_v52 = vsel %vm120_vm5, %v1616_v51, %v1661_v33  ;;  %v490_v19 = vsel %vm101_vm6, %v1620_v46, %v1665_v34 }
 0x250   :  { %639 = vmatprep.subr.mxu1 %v492_v8  ;;  %705 = vmatpush1.msra.mxu0 %v1472_v11  ;;  %v1728_v11 = vld [vmem:[%s1853_s3] sm:$0xff]  ;;  %v596_v51 = vsel %vm215_vm0, %v593_v39, %v595_v56  ;;  %v565_v46 = vsel %vm177_vm2, %v559_v45, %v1602_v28 }
 0x251   :  { %640 = vmatpush1.msra.mxu1 %v493_v44  ;;  %706 = vmatprep.subr.mxu0 %v526_v50  ;;  %v1719_v13 = vpop.permute.xlu1 %468  ;;  %v521_v57 = vpop.permute.xlu0 %520 }
 0x252   :  { %v475_v14 = vsel %vm82_vm7, %v1719_v13, %v1618_v38  ;;  %641 = vmatprep.subr.mxu1 %v474_v49  ;;  %707 = vmatpush1.msra.mxu0 %v527_v25  ;;  %v601_v38 = vsel %vm215_vm0, %v595_v56, %v1598_v40  ;;  %v524_v39 = vsel %vm139_vm4, %v521_v57, %v1663_v20 }
 0x253   :  { %642 = vmatpush1.msra.mxu1 %v475_v14  ;;  %708 = vmatprep.subr.mxu0 %v508_v52 }
 0x254   :  { %1079 = vmatmul.mubr.msk.f32.vlgmr.msra.gmra.mxu1 %vm228_vm8, %v1728_v11  ;;  %709 = vmatpush1.msra.mxu0 %v509_v15 }
 0x255   :  { %767 = vmatprep.subr.mxu1 %v601_v38  ;;  %710 = vmatprep.subr.mxu0 %v490_v19  ;;  %v577_v22 = vpop.permute.xlu1 %576  ;;  %v465_v61 = vpop.permute.xlu0 %464 }
 0x256   :  { %768 = vmatpush1.msra.mxu1 %v596_v51  ;;  %v578_v40 = vsel %vm196_vm1, %v1657_v29, %v577_v22  ;;  %711 = vmatpush1.msra.mxu0 %v491_v21  ;;  %v583_v27 = vsel %vm196_vm1, %v577_v22, %v1604_v43 }
 0x257   :  { %769 = vmatprep.subr.mxu1 %v583_v27  ;;  %817 = vmatprep.mubr.f32.mxu1 %v1104_v6 }
 0x258   :  { %770 = vmatpush1.msra.mxu1 %v578_v40 }
 0x259   :  { %771 = vmatprep.subr.mxu1 %v565_v46  ;;  %v541_v18 = vpop.permute.xlu1 %540 }
 0x25a   :  { %v542_v29 = vsel %vm158_vm3, %v1659_v31, %v541_v18  ;;  %772 = vmatpush1.msra.mxu1 %v560_v12  ;;  %v547_v43 = vsel %vm158_vm3, %v541_v18, %v1610_v48  ;;  %v525_v48 = vsel %vm139_vm4, %v1655_v26, %v521_v57  ;;  %v824_v26 = vld [vmem:[%s1854_s5] sm:$0xff] }
 0x25b   :  { %773 = vmatprep.subr.mxu1 %v547_v43 }
 0x25c   :  { %774 = vmatpush1.msra.mxu1 %v542_v29 }
 0x25d   :  { %775 = vmatprep.subr.mxu1 %v1556_v37  ;;  %v463_v28 = vpop.permute.xlu1 %462  ;;  %v485_v37 = vpop.permute.xlu0 %484 }
 0x25e   :  { %v473_v36 = vsel %vm82_vm7, %v1649_v17, %v463_v28  ;;  %776 = vmatpush1.msra.mxu1 %v1542_v32  ;;  %v472_v31 = vsel %vm82_vm7, %v463_v28, %v465_v61 }
 0x25f   :  { %712 = vmatprep.subr.mxu0 %v472_v31  ;;  %777 = vmatprep.subr.mxu1 %v524_v39 }
 0x260   :  { %713 = vmatpush1.msra.mxu0 %v473_v36  ;;  %778 = vmatpush1.msra.mxu1 %v525_v48 }
 0x261   :  { %1080 = vmatmul.mubr.msk.f32.vlgmr.msra.gmra.mxu0 %vm228_vm8, %v1728_v11  ;;  %v503_v32 = vpop.permute.xlu1 %502  ;;  %865 = vmatprep.subr.mxu0 %v1155_v0  ;;  %v488_v0 = vsel %vm101_vm6, %v485_v37, %v1674_v24 }
 0x262   :  { %v507_v17 = vsel %vm120_vm5, %v1661_v33, %v503_v32  ;;  %v506_v20 = vsel %vm120_vm5, %v503_v32, %v1697_v62  ;;  %866 = vmatpush1.msra.mxu0 %v1160_v1  ;;  %899 = vmatprep.mubr.f32.mxu0 %v1104_v6  ;;  %v489_v33 = vsel %vm101_vm6, %v1665_v34, %v485_v37 }
 0x263   :  { %779 = vmatprep.subr.mxu1 %v506_v20  ;;  %1007 = vmatprep.subr.mxu0 %v1212_v5 }
 0x264   :  { %780 = vmatpush1.msra.mxu1 %v507_v17 }
 0x265   :  { %781 = vmatprep.subr.mxu1 %v488_v0  ;;  %1082 = vmatmul.mubr.msk.f32.vlgmr.msra.gmra.mxu0 %vm831_vm9, %v824_v26  ;;  %v467_v1 = vpop.permute.xlu1 %466 }
 0x266   :  { %v471_v53 = vsel %vm82_vm7, %v465_v61, %v467_v1  ;;  %782 = vmatpush1.msra.mxu1 %v489_v33  ;;  %v470_v5 = vsel %vm82_vm7, %v467_v1, %v1719_v13  ;;  %1008 = vmatpush1.msra.mxu0 %v1199_v4  ;;  %v606_v54 = vpop.permute.xlu0 %605 }
 0x267   :  { %783 = vmatprep.subr.mxu1 %v470_v5  ;;  %1041 = vmatprep.mubr.f32.mxu0 %v1104_v6 }
 0x268   :  { %784 = vmatpush1.msra.mxu1 %v471_v53 }
 0x269   :  { %1081 = vmatmul.mubr.msk.f32.vlgmr.msra.gmra.mxu1 %vm228_vm8, %v1728_v11  ;;  %936 = vmatprep.subr.mxu1 %v1194_v3 }
 0x26a   :  { %1084 = vmatmul.mubr.msk.f32.vlgmr.msra.gmra.mxu0 %vm831_vm9, %v824_v26  ;;  %937 = vmatpush1.msra.mxu1 %v1169_v2 }
 0x26b   :  { %970 = vmatprep.mubr.f32.mxu1 %v1104_v6 }
 0x26d   :  { %1083 = vmatmul.mubr.msk.f32.vlgmr.msra.gmra.mxu1 %vm831_vm9, %v824_v26 }
 0x272   :  { %v829_v24 = vpop.permute.xlu1 %828 }
 0x314   :  { %v677_v10 = vpop.f32.mrf.mxu1 }
 0x315   :  { %v678_v56 = vadd.f32 %v677_v10, %v606_v54 }
 0x316   :  { %v679_v47 = vpop.f32.mrf.mxu1 }
 0x317   :  { %v680_v42 = vadd.f32 %v679_v47, %v606_v54 }
 0x321   :  { %v748_v34 = vpop.f32.mrf.mxu0 }
 0x322   :  { %v749_v52 = vadd.f32 %v748_v34, %v606_v54 }
 0x323   :  { %v750_v4 = vpop.f32.mrf.mxu0 }
 0x324   :  { %v751_v57 = vadd.f32 %v750_v4, %v606_v54 }
 0x325   :  { %v901_v55 = vpop.f32.mrf.mxu0 }
 0x326   :  { %v902_v59 = vadd.f32 %v901_v55, %v829_v24 }
 0x327   :  { %v903_v60 = vpop.f32.mrf.mxu0 }
 0x328   :  { %v1048_v3 = vadd.f32 %v902_v59, %v678_v56  ;;  %v904_v9 = vadd.f32 %v903_v60, %v829_v24 }
 0x329   :  { %v819_v41 = vpop.f32.mrf.mxu1 }
 0x32a   :  { %v1054_v62 = vmax.f32 %v1048_v3, 0.0  ;;  %v1049_v2 = vadd.f32 %v904_v9, %v680_v42  ;;  %v820_v7 = vadd.f32 %v819_v41, %v606_v54  ;;  %v1043_v6 = vpop.f32.mrf.mxu0 }
 0x32b   :  { %v1044_v45 = vadd.f32 %v1043_v6, %v829_v24  ;;  %v821_v8 = vpop.f32.mrf.mxu1 }
 0x32c   :  { %v1060_v44 = vmul.f32 %v1054_v62, %v1461_v58  ;;  %v1055_v50 = vmax.f32 %v1049_v2, 0.0  ;;  %v822_v25 = vadd.f32 %v821_v8, %v606_v54  ;;  %v1045_v13 = vpop.f32.mrf.mxu0 }
 0x32d   :  { %v1052_v49 = vadd.f32 %v1044_v45, %v820_v7  ;;  %v1046_v11 = vadd.f32 %v1045_v13, %v829_v24  ;;  %v972_v14 = vpop.f32.mrf.mxu1 }
 0x32e   :  { %1066 = vst [vmem:[%s1855_s8] sm:$0xff] %v1060_v44  ;;  %v1061_v15 = vmul.f32 %v1055_v50, %v1499_v16  ;;  %v973_v38 = vadd.f32 %v972_v14, %v829_v24 }
 0x32f   :  { %v1058_v19 = vmax.f32 %v1052_v49, 0.0  ;;  %v1053_v21 = vadd.f32 %v1046_v11, %v822_v25  ;;  %v974_v51 = vpop.f32.mrf.mxu1 }
 0x330   :  { %1067 = vst [vmem:[%s1855_s8 + $0x8] sm:$0xff] %v1061_v15  ;;  %v1050_v58 = vadd.f32 %v973_v38, %v749_v52  ;;  %v975_v22 = vadd.f32 %v974_v51, %v829_v24 }
 0x331   :  { %v1064_v40 = vmul.f32 %v1058_v19, %v1535_v30  ;;  %v1059_v27 = vmax.f32 %v1053_v21, 0.0 }
 0x332   :  { %v1056_v46 = vmax.f32 %v1050_v58, 0.0  ;;  %v1051_v12 = vadd.f32 %v975_v22, %v751_v57 }
 0x333   :  { %1070 = vst [vmem:[%s1855_s8 + $0x20] sm:$0xff] %v1064_v40  ;;  %v1065_v16 = vmul.f32 %v1059_v27, %v1549_v35 }
 0x334   :  { %v1062_v18 = vmul.f32 %v1056_v46, %v1469_v63  ;;  %v1057_v29 = vmax.f32 %v1051_v12, 0.0 }
 0x335   :  { %1071 = vst [vmem:[%s1855_s8 + $0x28] sm:$0xff] %v1065_v16 }
 0x336   :  { %1068 = vst [vmem:[%s1855_s8 + $0x10] sm:$0xff] %v1062_v18  ;;  %v1063_v30 = vmul.f32 %v1057_v29, %v1513_v23 }
 0x338   :  { %1069 = vst [vmem:[%s1855_s8 + $0x18] sm:$0xff] %v1063_v30 }

</bundles_post_ra>
